<compile_context>
chip_gen: v7x
topology: tpu7x:2x2x1
jax: 0.10.0
libtpu: 0.0.40
codegen_flags: <defaults>
</compile_context>

<pallas_src>
import numpy as np
import jax
import jax.numpy as jnp
from jax.experimental import pallas as pl
from jax.experimental.pallas import tpu as pltpu


# ----------------------------- config (small shapes) ------------------------------
B = 2                       # batch
C = 32                      # in_channels == out_channels (downscale=False requires equality)
H = W = 16                  # spatial
HW = H * W                  # 256 pixels per image
RD = int(round(C * 0.25))   # SqueezeExcite reduced channels (timm default rd_ratio=0.25) -> 8
BN_EPS = 1e-5

G = 4                       # pixels packed per 128-lane row (lane-dense packing)
CP = G * C                  # packed lane width = 128
RP = HW // G                # packed rows per image = 64
WR = W // G                 # packed rows per image row = 4 (dh=+/-1  <->  +/-WR rows)
PADP = 8                    # zero-pad rows on each side of the packed scratch (sublane aligned)

assert CP == 128 and W % G == 0 and WR & (WR - 1) == 0 and PADP >= WR + 1


# ----------------------------- in-kernel math helpers ------------------------------
def _gelu(v):
    """tanh-approximation GELU (EUP tanh; max |err| vs exact erf-GELU ~3e-4)."""
    c = 0.7978845608028654   # sqrt(2/pi)
    return 0.5 * v * (1.0 + jnp.tanh(c * (v + 0.044715 * v * v * v)))


# ----------------------------- Pallas kernel ---------------------------------------
def _mbconv_kernel(x_ref, vecs_ref, wdw_ref, wpw_ref, wred_ref, bred_ref, wexp_ref,
                   wproj_ref, o_ref, pad_ref):
    # x_ref:    (1, RP, CP)   one image, 4 consecutive pixels x 32 channels per 128-lane row
    # vecs_ref: (6, CP)       rows: [s0, b0, b1, b2, b_exp, b_proj], each channel-tiled x4
    # wdw_ref:  (9, CP)       depthwise 3x3 weights * BN1 scale, tap-major, channel-tiled x4
    # wpw_ref:  (CP, CP)      block-diag pointwise conv weight * BN2 scale (bf16)
    # wred_ref: (CP, RD)      SE reduce weight, stacked x4 (bf16);  bred_ref: (1, RD) f32
    # wexp_ref: (RD, CP)      SE expand weight, tiled x4 (bf16)
    # wproj_ref:(CP, CP)      block-diag final 1x1 projection weight (bf16)
    # o_ref:    (1, RP, CP)   output
    # pad_ref:  (RP+2*PADP, CP) VMEM scratch: zero-padded staging buffer for the dw conv
    x = x_ref[0]                                        # (RP, CP) original input (packed)
    s0 = vecs_ref[0:1, :]
    b0 = vecs_ref[1:2, :]
    b1 = vecs_ref[2:3, :]
    b2 = vecs_ref[3:4, :]
    b_exp = vecs_ref[4:5, :]
    b_proj = vecs_ref[5:6, :]

    # ---- pre-norm (eval BatchNorm folded to per-channel scale/bias) ---------------
    y = x * s0 + b0                                     # (RP, CP)

    # ---- stage y in the padded scratch (zero only the two pad bands) --------------
    pad_ref[pl.ds(0, PADP), :] = jnp.zeros((PADP, CP), jnp.float32)
    pad_ref[pl.ds(PADP + RP, PADP), :] = jnp.zeros((PADP, CP), jnp.float32)
    pad_ref[pl.ds(PADP, RP), :] = y

    # ---- masks for the W (image-row) boundary and the lane-group carry ------------
    rr = jax.lax.broadcasted_iota(jnp.int32, (RP, CP), 0)     # packed row index
    ll = jax.lax.broadcasted_iota(jnp.int32, (RP, CP), 1)     # lane index
    q0 = ll < C                                               # first pixel of the packed row
    q3 = ll >= (CP - C)                                       # last pixel of the packed row
    zero_l = q0 & ((rr & (WR - 1)) == 0)                      # dw=-1 tap crosses left edge
    zero_r = q3 & ((rr & (WR - 1)) == (WR - 1))               # dw=+1 tap crosses right edge

    # ---- depthwise 3x3 conv, stride 1, pad 1 ---------------------------------------
    # dh = +/-1 -> +/-WR packed-row slabs; dw = +/-1 -> XLU lane roll by +/-C with a
    # carry from the adjacent packed row for the edge lane group.
    acc = jnp.zeros((RP, CP), jnp.float32)
    for dh in (-1, 0, 1):
        base = PADP + dh * WR
        s_mid = pad_ref[pl.ds(base, RP), :]                   # pixels 4r + 16*dh + q
        s_up = pad_ref[pl.ds(base - 1, RP), :]                # one packed row earlier
        s_dn = pad_ref[pl.ds(base + 1, RP), :]                # one packed row later
        t = 3 * (dh + 1)

        # dw = -1: previous pixel = roll lanes by +C; group 0 carries from s_up
        tap_l = jnp.where(q0, pltpu.roll(s_up, C, 1), pltpu.roll(s_mid, C, 1))
        tap_l = jnp.where(zero_l, 0.0, tap_l)
        acc = acc + tap_l * wdw_ref[t:t + 1, :]

        # dw = 0
        acc = acc + s_mid * wdw_ref[t + 1:t + 2, :]

        # dw = +1: next pixel = roll lanes by -C (== +CP-C); group 3 carries from s_dn
        tap_r = jnp.where(q3, pltpu.roll(s_dn, CP - C, 1), pltpu.roll(s_mid, CP - C, 1))
        tap_r = jnp.where(zero_r, 0.0, tap_r)
        acc = acc + tap_r * wdw_ref[t + 2:t + 3, :]

    z = _gelu(acc + b1)                                  # BN1 bias + GELU

    # ---- pointwise 1x1 conv (+ folded BN2) + DepthwiseSeparableConv residual ------
    p = jnp.dot(z.astype(jnp.bfloat16), wpw_ref[...],
                preferred_element_type=jnp.float32) + b2 + y

    # ---- Squeeze-Excite ------------------------------------------------------------
    # sum over packed rows; the sum over the 4 pixel groups is folded into the
    # vertically-stacked reduce weight, so pool stays a single (1, CP) vector.
    pool = jnp.sum(p, axis=0, keepdims=True) * (1.0 / HW)                      # (1, CP)
    red = jnp.maximum(
        jnp.dot(pool.astype(jnp.bfloat16), wred_ref[...],
                preferred_element_type=jnp.float32) + bred_ref[...], 0.0)      # (1, RD)
    gate = jax.nn.sigmoid(
        jnp.dot(red.astype(jnp.bfloat16), wexp_ref[...],
                preferred_element_type=jnp.float32) + b_exp)                   # (1, CP)
    p = p * gate

    # ---- final 1x1 projection + outer residual with the ORIGINAL input ------------
    out = jnp.dot(p.astype(jnp.bfloat16), wproj_ref[...],
                  preferred_element_type=jnp.float32) + b_proj + x
    o_ref[0] = out.astype(o_ref.dtype)


# ----------------------------- wrapper ---------------------------------------------
def mbconv_forward(x_nchw, params):
    """MBConv forward (downscale=False, eval mode). x_nchw: (B, C, H, W) float32."""
    Bn, Cn, Hn, Wn = x_nchw.shape
    assert (Cn, Hn, Wn) == (C, H, W)

    # NCHW -> NHWC, flatten spatial, then pack 4 consecutive pixels per 128-lane row
    # (pure layout plumbing; contiguous reshape).
    x_pk = jnp.transpose(x_nchw, (0, 2, 3, 1)).reshape(Bn, RP, CP)

    # Fold eval-mode BatchNorms into per-channel scale/bias and into the conv weights
    # (one-time host-side weight transform).
    s0 = params["g0"] * jax.lax.rsqrt(params["v0"] + BN_EPS)
    b0 = params["be0"] - params["mu0"] * s0
    s1 = params["g1"] * jax.lax.rsqrt(params["v1"] + BN_EPS)
    b1 = params["be1"] - params["mu1"] * s1
    s2 = params["g2"] * jax.lax.rsqrt(params["v2"] + BN_EPS)
    b2 = params["be2"] - params["mu2"] * s2

    def t4(v):                       # tile a per-channel vector across the 4 pixel groups
        return jnp.tile(v, G)        # (CP,)

    vecs = jnp.stack([t4(s0), t4(b0), t4(b1), t4(b2),
                      t4(params["b_exp"]), t4(params["b_proj"])], axis=0)       # (6, CP)

    wdw9 = (params["w_dw"] * s1[None, None, :]).reshape(9, Cn)                   # (9, C)
    wdw9_t = jnp.tile(wdw9, (1, G))                                              # (9, CP)

    eye4 = jnp.eye(G, dtype=jnp.float32)
    # Block-diagonal 1x1 conv weights so packed (RP, CP) x (CP, CP) matmuls are lane-dense;
    # weights cast to bf16 for single-pass MXU issue (accumulation stays f32 in-kernel).
    wpw_bd = jnp.kron(eye4, params["w_pw"] * s2[None, :]).astype(jnp.bfloat16)   # (CP, CP)
    wproj_bd = jnp.kron(eye4, params["w_proj"]).astype(jnp.bfloat16)             # (CP, CP)
    wred_stk = jnp.tile(params["w_red"], (G, 1)).astype(jnp.bfloat16)            # (CP, RD)
    wexp_t = jnp.tile(params["w_exp"], (1, G)).astype(jnp.bfloat16)              # (RD, CP)
    bred = params["b_red"].reshape(1, RD)

    out_pk = pl.pallas_call(
        _mbconv_kernel,
        out_shape=jax.ShapeDtypeStruct((Bn, RP, CP), x_nchw.dtype),
        grid_spec=pltpu.PrefetchScalarGridSpec(
            num_scalar_prefetch=0,
            grid=(Bn,),
            in_specs=[
                pl.BlockSpec((1, RP, CP), lambda b: (b, 0, 0)),   # x (one image per step)
                pl.BlockSpec((6, CP), lambda b: (0, 0)),          # folded affine vectors
                pl.BlockSpec((9, CP), lambda b: (0, 0)),          # depthwise weights
                pl.BlockSpec((CP, CP), lambda b: (0, 0)),         # block-diag pointwise weight
                pl.BlockSpec((CP, RD), lambda b: (0, 0)),         # SE reduce weight (stacked)
                pl.BlockSpec((1, RD), lambda b: (0, 0)),          # SE reduce bias
                pl.BlockSpec((RD, CP), lambda b: (0, 0)),         # SE expand weight (tiled)
                pl.BlockSpec((CP, CP), lambda b: (0, 0)),         # block-diag projection weight
            ],
            out_specs=pl.BlockSpec((1, RP, CP), lambda b: (b, 0, 0)),
            scratch_shapes=[pltpu.VMEM((RP + 2 * PADP, CP), jnp.float32)],
        ),
        compiler_params=pltpu.CompilerParams(dimension_semantics=("parallel",)),
    )(x_pk, vecs, wdw9_t, wpw_bd, wred_stk, bred, wexp_t, wproj_bd)

    return jnp.transpose(out_pk.reshape(Bn, Hn, Wn, Cn), (0, 3, 1, 2))


# ----------------------------- plain-JAX reference (for checking) -------------------
def reference(x_nchw, params):
    """XLA reference mirroring the PyTorch MBConv forward (eval mode, drop_path=0)."""
    hp = jax.lax.Precision.HIGHEST
    x = jnp.transpose(x_nchw, (0, 2, 3, 1))                        # NHWC

    def bn(t, g, b, mu, var):
        return (t - mu) * (g * jax.lax.rsqrt(var + BN_EPS)) + b

    y = bn(x, params["g0"], params["be0"], params["mu0"], params["v0"])
    z = jax.lax.conv_general_dilated(
        y, params["w_dw"].reshape(3, 3, 1, C), window_strides=(1, 1),
        padding=((1, 1), (1, 1)), dimension_numbers=("NHWC", "HWIO", "NHWC"),
        feature_group_count=C, precision=hp)
    z = jax.nn.gelu(bn(z, params["g1"], params["be1"], params["mu1"], params["v1"]),
                    approximate=False)
    z = jnp.einsum("bhwc,cd->bhwd", z, params["w_pw"], precision=hp)
    z = bn(z, params["g2"], params["be2"], params["mu2"], params["v2"]) + y   # DSConv skip
    pool = jnp.mean(z, axis=(1, 2), keepdims=True)
    red = jax.nn.relu(jnp.einsum("bhwc,cd->bhwd", pool, params["w_red"], precision=hp)
                      + params["b_red"])
    gate = jax.nn.sigmoid(jnp.einsum("bhwc,cd->bhwd", red, params["w_exp"], precision=hp)
                          + params["b_exp"])
    z = z * gate
    o = jnp.einsum("bhwc,cd->bhwd", z, params["w_proj"], precision=hp) + params["b_proj"] + x
    return jnp.transpose(o, (0, 3, 1, 2))


# ----------------------------- main --------------------------------------------------
if __name__ == "__main__":
    key = jax.random.PRNGKey(0)
    ks = jax.random.split(key, 24)

    x = jax.random.normal(ks[0], (B, C, H, W), dtype=jnp.float32)

    def _bn_params(kg, kb, km, kv):
        return (1.0 + 0.1 * jax.random.normal(kg, (C,), jnp.float32),
                0.1 * jax.random.normal(kb, (C,), jnp.float32),
                0.1 * jax.random.normal(km, (C,), jnp.float32),
                jax.random.uniform(kv, (C,), jnp.float32, 0.5, 1.5))

    g0, be0, mu0, v0 = _bn_params(ks[1], ks[2], ks[3], ks[4])
    g1, be1, mu1, v1 = _bn_params(ks[5], ks[6], ks[7], ks[8])
    g2, be2, mu2, v2 = _bn_params(ks[9], ks[10], ks[11], ks[12])

    # Synthetic deterministic weights. Layout notes vs. PyTorch:
    #   depthwise Conv2d weight (C,1,3,3) -> stored here as (3,3,C)
    #   1x1 Conv2d weights (out,in,1,1)   -> stored here as [in, out]
    params = dict(
        g0=g0, be0=be0, mu0=mu0, v0=v0,
        w_dw=0.2 * jax.random.normal(ks[13], (3, 3, C), jnp.float32),
        g1=g1, be1=be1, mu1=mu1, v1=v1,
        w_pw=0.1 * jax.random.normal(ks[14], (C, C), jnp.float32),
        g2=g2, be2=be2, mu2=mu2, v2=v2,
        w_red=0.3 * jax.random.normal(ks[15], (C, RD), jnp.float32),
        b_red=0.1 * jax.random.normal(ks[16], (RD,), jnp.float32),
        w_exp=0.3 * jax.random.normal(ks[17], (RD, C), jnp.float32),
        b_exp=0.1 * jax.random.normal(ks[18], (C,), jnp.float32),
        w_proj=0.1 * jax.random.normal(ks[19], (C, C), jnp.float32),
        b_proj=0.1 * jax.random.normal(ks[20], (C,), jnp.float32),
    )

    out = mbconv_forward(x, params)
    out = jax.block_until_ready(out)

    ref = reference(x, params)
    assert out.shape == (B, C, H, W)
    # Tolerance budget: bf16 MXU operands on the two (K=32-effective) 1x1 convs (~1e-3
    # level) plus the tanh-approx GELU (<=~3e-4 vs exact erf), both adopted per the
    # performance review, compared against a HIGHEST-precision f32 XLA reference.
    # Structural bugs produce errors orders of magnitude larger than this.
    np.testing.assert_allclose(np.asarray(out), np.asarray(ref), atol=5e-3, rtol=5e-3)

    print("KERNEL_OK")
</pallas_src>

<mosaic_0001>
module attributes {stable_mosaic.version = 11 : i64} {
  func.func @_mbconv_kernel(%arg0: i32, %arg1: memref<1x64x128xf32, #tpu.memory_space<vmem>>, %arg2: memref<6x128xf32, #tpu.memory_space<vmem>>, %arg3: memref<9x128xf32, #tpu.memory_space<vmem>>, %arg4: memref<128x128xbf16, #tpu.memory_space<vmem>>, %arg5: memref<128x8xbf16, #tpu.memory_space<vmem>>, %arg6: memref<1x8xf32, #tpu.memory_space<vmem>>, %arg7: memref<8x128xbf16, #tpu.memory_space<vmem>>, %arg8: memref<128x128xbf16, #tpu.memory_space<vmem>>, %arg9: memref<1x64x128xf32, #tpu.memory_space<vmem>>, %arg10: memref<80x128xf32, #tpu.memory_space<vmem>>) attributes {dimension_semantics = [#tpu.dimension_semantics<parallel>], iteration_bounds = array<i64: 2>, scalar_prefetch = 0 : i64, scratch_operands = 1 : i64, tpu.core_type = #tpu.core_type<tc>, window_params = [{transform_indices = @transform_0, window_bounds = array<i64: 1, 64, 128>}, {pipeline_mode = #tpu.pipeline_mode<synchronous>, transform_indices = @transform_1, window_bounds = array<i64: 6, 128>}, {pipeline_mode = #tpu.pipeline_mode<synchronous>, transform_indices = @transform_2, window_bounds = array<i64: 9, 128>}, {pipeline_mode = #tpu.pipeline_mode<synchronous>, transform_indices = @transform_3, window_bounds = array<i64: 128, 128>}, {pipeline_mode = #tpu.pipeline_mode<synchronous>, transform_indices = @transform_4, window_bounds = array<i64: 128, 8>}, {pipeline_mode = #tpu.pipeline_mode<synchronous>, transform_indices = @transform_5, window_bounds = array<i64: 1, 8>}, {pipeline_mode = #tpu.pipeline_mode<synchronous>, transform_indices = @transform_6, window_bounds = array<i64: 8, 128>}, {pipeline_mode = #tpu.pipeline_mode<synchronous>, transform_indices = @transform_7, window_bounds = array<i64: 128, 128>}, {transform_indices = @transform_8, window_bounds = array<i64: 1, 64, 128>}]} {
    %c0 = arith.constant 0 : index
    %c0_0 = arith.constant 0 : index
    %c0_1 = arith.constant 0 : index
    %0 = vector.load %arg1[%c0, %c0_0, %c0_1] : memref<1x64x128xf32, #tpu.memory_space<vmem>>, vector<1x64x128xf32>
    %1 = vector.shape_cast %0 : vector<1x64x128xf32> to vector<64x128xf32>
    %c0_2 = arith.constant 0 : index
    %c0_3 = arith.constant 0 : index
    %2 = vector.load %arg2[%c0_2, %c0_3] : memref<6x128xf32, #tpu.memory_space<vmem>>, vector<1x128xf32>
    %c1 = arith.constant 1 : index
    %c0_4 = arith.constant 0 : index
    %3 = vector.load %arg2[%c1, %c0_4] : memref<6x128xf32, #tpu.memory_space<vmem>>, vector<1x128xf32>
    %c2 = arith.constant 2 : index
    %c0_5 = arith.constant 0 : index
    %4 = vector.load %arg2[%c2, %c0_5] : memref<6x128xf32, #tpu.memory_space<vmem>>, vector<1x128xf32>
    %c3 = arith.constant 3 : index
    %c0_6 = arith.constant 0 : index
    %5 = vector.load %arg2[%c3, %c0_6] : memref<6x128xf32, #tpu.memory_space<vmem>>, vector<1x128xf32>
    %c4 = arith.constant 4 : index
    %c0_7 = arith.constant 0 : index
    %6 = vector.load %arg2[%c4, %c0_7] : memref<6x128xf32, #tpu.memory_space<vmem>>, vector<1x128xf32>
    %c5 = arith.constant 5 : index
    %c0_8 = arith.constant 0 : index
    %7 = vector.load %arg2[%c5, %c0_8] : memref<6x128xf32, #tpu.memory_space<vmem>>, vector<1x128xf32>
    %8 = vector.broadcast %2 : vector<1x128xf32> to vector<64x128xf32>
    %9 = arith.mulf %1, %8 : vector<64x128xf32>
    %10 = vector.broadcast %3 : vector<1x128xf32> to vector<64x128xf32>
    %11 = arith.addf %9, %10 : vector<64x128xf32>
    %cst = arith.constant 0.000000e+00 : f32
    %12 = vector.broadcast %cst : f32 to vector<8x128xf32>
    %c0_9 = arith.constant 0 : index
    %c0_10 = arith.constant 0 : index
    %13 = vector.load %arg10[%c0_9, %c0_10] : memref<80x128xf32, #tpu.memory_space<vmem>>, vector<8x128xf32>
    tpu.vector_store %arg10[%c0_9, %c0_10], %12 {strides = array<i32>} : memref<80x128xf32, #tpu.memory_space<vmem>>, vector<8x128xf32>,
    %cst_11 = arith.constant 0.000000e+00 : f32
    %14 = vector.broadcast %cst_11 : f32 to vector<8x128xf32>
    %c72 = arith.constant 72 : index
    %c0_12 = arith.constant 0 : index
    %15 = vector.load %arg10[%c72, %c0_12] : memref<80x128xf32, #tpu.memory_space<vmem>>, vector<8x128xf32>
    tpu.vector_store %arg10[%c72, %c0_12], %14 {strides = array<i32>} : memref<80x128xf32, #tpu.memory_space<vmem>>, vector<8x128xf32>,
    %c8 = arith.constant 8 : index
    %c0_13 = arith.constant 0 : index
    %16 = vector.load %arg10[%c8, %c0_13] : memref<80x128xf32, #tpu.memory_space<vmem>>, vector<64x128xf32>
    tpu.vector_store %arg10[%c8, %c0_13], %11 {strides = array<i32>} : memref<80x128xf32, #tpu.memory_space<vmem>>, vector<64x128xf32>,
    %17 = tpu.iota {dimensions = array<i32: 0>} : vector<64x128xi32>
    %18 = tpu.iota {dimensions = array<i32: 1>} : vector<64x128xi32>
    %c32_i32 = arith.constant 32 : i32
    %19 = vector.broadcast %c32_i32 : i32 to vector<64x128xi32>
    %20 = arith.cmpi slt, %18, %19 : vector<64x128xi32>
    %c96_i32 = arith.constant 96 : i32
    %21 = vector.broadcast %c96_i32 : i32 to vector<64x128xi32>
    %22 = arith.cmpi sge, %18, %21 : vector<64x128xi32>
    %c3_i32 = arith.constant 3 : i32
    %23 = vector.broadcast %c3_i32 : i32 to vector<64x128xi32>
    %24 = arith.andi %17, %23 : vector<64x128xi32>
    %c0_i32 = arith.constant 0 : i32
    %25 = vector.broadcast %c0_i32 : i32 to vector<64x128xi32>
    %26 = arith.cmpi eq, %24, %25 : vector<64x128xi32>
    %27 = arith.andi %20, %26 : vector<64x128xi1>
    %c3_i32_14 = arith.constant 3 : i32
    %28 = vector.broadcast %c3_i32_14 : i32 to vector<64x128xi32>
    %29 = arith.andi %17, %28 : vector<64x128xi32>
    %c3_i32_15 = arith.constant 3 : i32
    %30 = vector.broadcast %c3_i32_15 : i32 to vector<64x128xi32>
    %31 = arith.cmpi eq, %29, %30 : vector<64x128xi32>
    %32 = arith.andi %22, %31 : vector<64x128xi1>
    %cst_16 = arith.constant 0.000000e+00 : f32
    %33 = vector.broadcast %cst_16 : f32 to vector<64x128xf32>
    %c4_17 = arith.constant 4 : index
    %c0_18 = arith.constant 0 : index
    %34 = vector.load %arg10[%c4_17, %c0_18] : memref<80x128xf32, #tpu.memory_space<vmem>>, vector<64x128xf32>
    %c3_19 = arith.constant 3 : index
    %c0_20 = arith.constant 0 : index
    %35 = vector.load %arg10[%c3_19, %c0_20] : memref<80x128xf32, #tpu.memory_space<vmem>>, vector<64x128xf32>
    %c5_21 = arith.constant 5 : index
    %c0_22 = arith.constant 0 : index
    %36 = vector.load %arg10[%c5_21, %c0_22] : memref<80x128xf32, #tpu.memory_space<vmem>>, vector<64x128xf32>
    %c32_i32_23 = arith.constant 32 : i32
    %37 = tpu.dynamic_rotate %35 by %c32_i32_23 dim 1 : vector<64x128xf32>, i32 -> vector<64x128xf32>
    %c32_i32_24 = arith.constant 32 : i32
    %38 = tpu.dynamic_rotate %34 by %c32_i32_24 dim 1 : vector<64x128xf32>, i32 -> vector<64x128xf32>
    %39 = arith.select %20, %37, %38 : vector<64x128xi1>, vector<64x128xf32>
    %cst_25 = arith.constant 0.000000e+00 : f32
    %40 = vector.broadcast %cst_25 : f32 to vector<64x128xf32>
    %41 = arith.select %27, %40, %39 : vector<64x128xi1>, vector<64x128xf32>
    %c0_26 = arith.constant 0 : index
    %c0_27 = arith.constant 0 : index
    %42 = vector.load %arg3[%c0_26, %c0_27] : memref<9x128xf32, #tpu.memory_space<vmem>>, vector<1x128xf32>
    %43 = vector.broadcast %42 : vector<1x128xf32> to vector<64x128xf32>
    %44 = arith.mulf %41, %43 : vector<64x128xf32>
    %45 = arith.addf %33, %44 : vector<64x128xf32>
    %c1_28 = arith.constant 1 : index
    %c0_29 = arith.constant 0 : index
    %46 = vector.load %arg3[%c1_28, %c0_29] : memref<9x128xf32, #tpu.memory_space<vmem>>, vector<1x128xf32>
    %47 = vector.broadcast %46 : vector<1x128xf32> to vector<64x128xf32>
    %48 = arith.mulf %34, %47 : vector<64x128xf32>
    %49 = arith.addf %45, %48 : vector<64x128xf32>
    %c96_i32_30 = arith.constant 96 : i32
    %50 = tpu.dynamic_rotate %36 by %c96_i32_30 dim 1 : vector<64x128xf32>, i32 -> vector<64x128xf32>
    %c96_i32_31 = arith.constant 96 : i32
    %51 = tpu.dynamic_rotate %34 by %c96_i32_31 dim 1 : vector<64x128xf32>, i32 -> vector<64x128xf32>
    %52 = arith.select %22, %50, %51 : vector<64x128xi1>, vector<64x128xf32>
    %cst_32 = arith.constant 0.000000e+00 : f32
    %53 = vector.broadcast %cst_32 : f32 to vector<64x128xf32>
    %54 = arith.select %32, %53, %52 : vector<64x128xi1>, vector<64x128xf32>
    %c2_33 = arith.constant 2 : index
    %c0_34 = arith.constant 0 : index
    %55 = vector.load %arg3[%c2_33, %c0_34] : memref<9x128xf32, #tpu.memory_space<vmem>>, vector<1x128xf32>
    %56 = vector.broadcast %55 : vector<1x128xf32> to vector<64x128xf32>
    %57 = arith.mulf %54, %56 : vector<64x128xf32>
    %58 = arith.addf %49, %57 : vector<64x128xf32>
    %c8_35 = arith.constant 8 : index
    %c0_36 = arith.constant 0 : index
    %59 = vector.load %arg10[%c8_35, %c0_36] : memref<80x128xf32, #tpu.memory_space<vmem>>, vector<64x128xf32>
    %c7 = arith.constant 7 : index
    %c0_37 = arith.constant 0 : index
    %60 = vector.load %arg10[%c7, %c0_37] : memref<80x128xf32, #tpu.memory_space<vmem>>, vector<64x128xf32>
    %c9 = arith.constant 9 : index
    %c0_38 = arith.constant 0 : index
    %61 = vector.load %arg10[%c9, %c0_38] : memref<80x128xf32, #tpu.memory_space<vmem>>, vector<64x128xf32>
    %c32_i32_39 = arith.constant 32 : i32
    %62 = tpu.dynamic_rotate %60 by %c32_i32_39 dim 1 : vector<64x128xf32>, i32 -> vector<64x128xf32>
    %c32_i32_40 = arith.constant 32 : i32
    %63 = tpu.dynamic_rotate %59 by %c32_i32_40 dim 1 : vector<64x128xf32>, i32 -> vector<64x128xf32>
    %64 = arith.select %20, %62, %63 : vector<64x128xi1>, vector<64x128xf32>
    %cst_41 = arith.constant 0.000000e+00 : f32
    %65 = vector.broadcast %cst_41 : f32 to vector<64x128xf32>
    %66 = arith.select %27, %65, %64 : vector<64x128xi1>, vector<64x128xf32>
    %c3_42 = arith.constant 3 : index
    %c0_43 = arith.constant 0 : index
    %67 = vector.load %arg3[%c3_42, %c0_43] : memref<9x128xf32, #tpu.memory_space<vmem>>, vector<1x128xf32>
    %68 = vector.broadcast %67 : vector<1x128xf32> to vector<64x128xf32>
    %69 = arith.mulf %66, %68 : vector<64x128xf32>
    %70 = arith.addf %58, %69 : vector<64x128xf32>
    %c4_44 = arith.constant 4 : index
    %c0_45 = arith.constant 0 : index
    %71 = vector.load %arg3[%c4_44, %c0_45] : memref<9x128xf32, #tpu.memory_space<vmem>>, vector<1x128xf32>
    %72 = vector.broadcast %71 : vector<1x128xf32> to vector<64x128xf32>
    %73 = arith.mulf %59, %72 : vector<64x128xf32>
    %74 = arith.addf %70, %73 : vector<64x128xf32>
    %c96_i32_46 = arith.constant 96 : i32
    %75 = tpu.dynamic_rotate %61 by %c96_i32_46 dim 1 : vector<64x128xf32>, i32 -> vector<64x128xf32>
    %c96_i32_47 = arith.constant 96 : i32
    %76 = tpu.dynamic_rotate %59 by %c96_i32_47 dim 1 : vector<64x128xf32>, i32 -> vector<64x128xf32>
    %77 = arith.select %22, %75, %76 : vector<64x128xi1>, vector<64x128xf32>
    %cst_48 = arith.constant 0.000000e+00 : f32
    %78 = vector.broadcast %cst_48 : f32 to vector<64x128xf32>
    %79 = arith.select %32, %78, %77 : vector<64x128xi1>, vector<64x128xf32>
    %c5_49 = arith.constant 5 : index
    %c0_50 = arith.constant 0 : index
    %80 = vector.load %arg3[%c5_49, %c0_50] : memref<9x128xf32, #tpu.memory_space<vmem>>, vector<1x128xf32>
    %81 = vector.broadcast %80 : vector<1x128xf32> to vector<64x128xf32>
    %82 = arith.mulf %79, %81 : vector<64x128xf32>
    %83 = arith.addf %74, %82 : vector<64x128xf32>
    %c12 = arith.constant 12 : index
    %c0_51 = arith.constant 0 : index
    %84 = vector.load %arg10[%c12, %c0_51] : memref<80x128xf32, #tpu.memory_space<vmem>>, vector<64x128xf32>
    %c11 = arith.constant 11 : index
    %c0_52 = arith.constant 0 : index
    %85 = vector.load %arg10[%c11, %c0_52] : memref<80x128xf32, #tpu.memory_space<vmem>>, vector<64x128xf32>
    %c13 = arith.constant 13 : index
    %c0_53 = arith.constant 0 : index
    %86 = vector.load %arg10[%c13, %c0_53] : memref<80x128xf32, #tpu.memory_space<vmem>>, vector<64x128xf32>
    %c32_i32_54 = arith.constant 32 : i32
    %87 = tpu.dynamic_rotate %85 by %c32_i32_54 dim 1 : vector<64x128xf32>, i32 -> vector<64x128xf32>
    %c32_i32_55 = arith.constant 32 : i32
    %88 = tpu.dynamic_rotate %84 by %c32_i32_55 dim 1 : vector<64x128xf32>, i32 -> vector<64x128xf32>
    %89 = arith.select %20, %87, %88 : vector<64x128xi1>, vector<64x128xf32>
    %cst_56 = arith.constant 0.000000e+00 : f32
    %90 = vector.broadcast %cst_56 : f32 to vector<64x128xf32>
    %91 = arith.select %27, %90, %89 : vector<64x128xi1>, vector<64x128xf32>
    %c6 = arith.constant 6 : index
    %c0_57 = arith.constant 0 : index
    %92 = vector.load %arg3[%c6, %c0_57] : memref<9x128xf32, #tpu.memory_space<vmem>>, vector<1x128xf32>
    %93 = vector.broadcast %92 : vector<1x128xf32> to vector<64x128xf32>
    %94 = arith.mulf %91, %93 : vector<64x128xf32>
    %95 = arith.addf %83, %94 : vector<64x128xf32>
    %c7_58 = arith.constant 7 : index
    %c0_59 = arith.constant 0 : index
    %96 = vector.load %arg3[%c7_58, %c0_59] : memref<9x128xf32, #tpu.memory_space<vmem>>, vector<1x128xf32>
    %97 = vector.broadcast %96 : vector<1x128xf32> to vector<64x128xf32>
    %98 = arith.mulf %84, %97 : vector<64x128xf32>
    %99 = arith.addf %95, %98 : vector<64x128xf32>
    %c96_i32_60 = arith.constant 96 : i32
    %100 = tpu.dynamic_rotate %86 by %c96_i32_60 dim 1 : vector<64x128xf32>, i32 -> vector<64x128xf32>
    %c96_i32_61 = arith.constant 96 : i32
    %101 = tpu.dynamic_rotate %84 by %c96_i32_61 dim 1 : vector<64x128xf32>, i32 -> vector<64x128xf32>
    %102 = arith.select %22, %100, %101 : vector<64x128xi1>, vector<64x128xf32>
    %cst_62 = arith.constant 0.000000e+00 : f32
    %103 = vector.broadcast %cst_62 : f32 to vector<64x128xf32>
    %104 = arith.select %32, %103, %102 : vector<64x128xi1>, vector<64x128xf32>
    %c8_63 = arith.constant 8 : index
    %c0_64 = arith.constant 0 : index
    %105 = vector.load %arg3[%c8_63, %c0_64] : memref<9x128xf32, #tpu.memory_space<vmem>>, vector<1x128xf32>
    %106 = vector.broadcast %105 : vector<1x128xf32> to vector<64x128xf32>
    %107 = arith.mulf %104, %106 : vector<64x128xf32>
    %108 = arith.addf %99, %107 : vector<64x128xf32>
    %109 = vector.broadcast %4 : vector<1x128xf32> to vector<64x128xf32>
    %110 = arith.addf %108, %109 : vector<64x128xf32>
    %cst_65 = arith.constant 5.000000e-01 : f32
    %111 = vector.broadcast %cst_65 : f32 to vector<64x128xf32>
    %112 = arith.mulf %111, %110 : vector<64x128xf32>
    %cst_66 = arith.constant 4.471500e-02 : f32
    %113 = vector.broadcast %cst_66 : f32 to vector<64x128xf32>
    %114 = arith.mulf %113, %110 : vector<64x128xf32>
    %115 = arith.mulf %114, %110 : vector<64x128xf32>
    %116 = arith.mulf %115, %110 : vector<64x128xf32>
    %117 = arith.addf %110, %116 : vector<64x128xf32>
    %cst_67 = arith.constant 0.797884583 : f32
    %118 = vector.broadcast %cst_67 : f32 to vector<64x128xf32>
    %119 = arith.mulf %118, %117 : vector<64x128xf32>
    %120 = math.tanh %119 : vector<64x128xf32>
    %cst_68 = arith.constant 1.000000e+00 : f32
    %121 = vector.broadcast %cst_68 : f32 to vector<64x128xf32>
    %122 = arith.addf %121, %120 : vector<64x128xf32>
    %123 = arith.mulf %112, %122 : vector<64x128xf32>
    %124 = arith.truncf %123 : vector<64x128xf32> to vector<64x128xbf16>
    %c0_69 = arith.constant 0 : index
    %c0_70 = arith.constant 0 : index
    %125 = vector.load %arg4[%c0_69, %c0_70] : memref<128x128xbf16, #tpu.memory_space<vmem>>, vector<128x128xbf16>
    %cst_71 = arith.constant dense<0.000000e+00> : vector<64x128xf32>
    %126 = tpu.matmul %124, %125, %cst_71 {dimension_numbers = #tpu.dot_dimension_numbers<[1], [0], [0], [1], [0, 0, 1, 1], [], []>} : vector<64x128xbf16>, vector<128x128xbf16>, vector<64x128xf32> -> vector<64x128xf32>
    %127 = vector.broadcast %5 : vector<1x128xf32> to vector<64x128xf32>
    %128 = arith.addf %126, %127 : vector<64x128xf32>
    %129 = arith.addf %128, %11 : vector<64x128xf32>
    %cst_72 = arith.constant dense<0.000000e+00> : vector<128xf32>
    %130 = vector.multi_reduction <add>, %129, %cst_72 [0] : vector<64x128xf32> to vector<128xf32>
    %131 = vector.shape_cast %130 : vector<128xf32> to vector<1x128xf32>
    %cst_73 = arith.constant 3.906250e-03 : f32
    %132 = vector.broadcast %cst_73 : f32 to vector<1x128xf32>
    %133 = arith.mulf %131, %132 : vector<1x128xf32>
    %134 = arith.truncf %133 : vector<1x128xf32> to vector<1x128xbf16>
    %c0_74 = arith.constant 0 : index
    %c0_75 = arith.constant 0 : index
    %135 = vector.load %arg5[%c0_74, %c0_75] : memref<128x8xbf16, #tpu.memory_space<vmem>>, vector<128x8xbf16>
    %cst_76 = arith.constant dense<0.000000e+00> : vector<1x8xf32>
    %136 = tpu.matmul %134, %135, %cst_76 {dimension_numbers = #tpu.dot_dimension_numbers<[1], [0], [0], [1], [0, 0, 1, 1], [], []>} : vector<1x128xbf16>, vector<128x8xbf16>, vector<1x8xf32> -> vector<1x8xf32>
    %c0_77 = arith.constant 0 : index
    %c0_78 = arith.constant 0 : index
    %137 = vector.load %arg6[%c0_77, %c0_78] : memref<1x8xf32, #tpu.memory_space<vmem>>, vector<1x8xf32>
    %138 = arith.addf %136, %137 : vector<1x8xf32>
    %cst_79 = arith.constant 0.000000e+00 : f32
    %139 = vector.broadcast %cst_79 : f32 to vector<1x8xf32>
    %140 = arith.maximumf %138, %139 : vector<1x8xf32>
    %141 = arith.truncf %140 : vector<1x8xf32> to vector<1x8xbf16>
    %c0_80 = arith.constant 0 : index
    %c0_81 = arith.constant 0 : index
    %142 = vector.load %arg7[%c0_80, %c0_81] : memref<8x128xbf16, #tpu.memory_space<vmem>>, vector<8x128xbf16>
    %cst_82 = arith.constant dense<0.000000e+00> : vector<1x128xf32>
    %143 = tpu.matmul %141, %142, %cst_82 {dimension_numbers = #tpu.dot_dimension_numbers<[1], [0], [0], [1], [0, 0, 1, 1], [], []>} : vector<1x8xbf16>, vector<8x128xbf16>, vector<1x128xf32> -> vector<1x128xf32>
    %144 = arith.addf %143, %6 : vector<1x128xf32>
    %145 = arith.negf %144 : vector<1x128xf32>
    %146 = math.exp %145 : vector<1x128xf32>
    %cst_83 = arith.constant 1.000000e+00 : f32
    %147 = vector.broadcast %cst_83 : f32 to vector<1x128xf32>
    %148 = arith.addf %147, %146 : vector<1x128xf32>
    %149 = arith.divf %147, %148 : vector<1x128xf32>
    %150 = vector.broadcast %149 : vector<1x128xf32> to vector<64x128xf32>
    %151 = arith.mulf %129, %150 : vector<64x128xf32>
    %152 = arith.truncf %151 : vector<64x128xf32> to vector<64x128xbf16>
    %c0_84 = arith.constant 0 : index
    %c0_85 = arith.constant 0 : index
    %153 = vector.load %arg8[%c0_84, %c0_85] : memref<128x128xbf16, #tpu.memory_space<vmem>>, vector<128x128xbf16>
    %cst_86 = arith.constant dense<0.000000e+00> : vector<64x128xf32>
    %154 = tpu.matmul %152, %153, %cst_86 {dimension_numbers = #tpu.dot_dimension_numbers<[1], [0], [0], [1], [0, 0, 1, 1], [], []>} : vector<64x128xbf16>, vector<128x128xbf16>, vector<64x128xf32> -> vector<64x128xf32>
    %155 = vector.broadcast %7 : vector<1x128xf32> to vector<64x128xf32>
    %156 = arith.addf %154, %155 : vector<64x128xf32>
    %157 = arith.addf %156, %1 : vector<64x128xf32>
    %c0_87 = arith.constant 0 : index
    %c0_88 = arith.constant 0 : index
    %c0_89 = arith.constant 0 : index
    %158 = vector.load %arg9[%c0_87, %c0_88, %c0_89] : memref<1x64x128xf32, #tpu.memory_space<vmem>>, vector<1x64x128xf32>
    %159 = vector.shape_cast %158 : vector<1x64x128xf32> to vector<64x128xf32>
    %160 = vector.shape_cast %157 : vector<64x128xf32> to vector<1x64x128xf32>
    tpu.vector_store %arg9[%c0_87, %c0_88, %c0_89], %160 {strides = array<i32>} : memref<1x64x128xf32, #tpu.memory_space<vmem>>, vector<1x64x128xf32>,
    return
  }
  func.func @transform_0(%arg0: i32) -> (i32, i32, i32) {
    %c0_i32 = arith.constant 0 : i32
    %c0_i32_0 = arith.constant 0 : i32
    %c0_i32_1 = arith.constant 0 : i32
    return %arg0, %c0_i32, %c0_i32_0 : i32, i32, i32
  }
  func.func @transform_1(%arg0: i32) -> (i32, i32) {
    %c0_i32 = arith.constant 0 : i32
    %c0_i32_0 = arith.constant 0 : i32
    %c0_i32_1 = arith.constant 0 : i32
    return %c0_i32, %c0_i32_0 : i32, i32
  }
  func.func @transform_2(%arg0: i32) -> (i32, i32) {
    %c0_i32 = arith.constant 0 : i32
    %c0_i32_0 = arith.constant 0 : i32
    %c0_i32_1 = arith.constant 0 : i32
    return %c0_i32, %c0_i32_0 : i32, i32
  }
  func.func @transform_3(%arg0: i32) -> (i32, i32) {
    %c0_i32 = arith.constant 0 : i32
    %c0_i32_0 = arith.constant 0 : i32
    %c0_i32_1 = arith.constant 0 : i32
    return %c0_i32, %c0_i32_0 : i32, i32
  }
  func.func @transform_4(%arg0: i32) -> (i32, i32) {
    %c0_i32 = arith.constant 0 : i32
    %c0_i32_0 = arith.constant 0 : i32
    %c0_i32_1 = arith.constant 0 : i32
    return %c0_i32, %c0_i32_0 : i32, i32
  }
  func.func @transform_5(%arg0: i32) -> (i32, i32) {
    %c0_i32 = arith.constant 0 : i32
    %c0_i32_0 = arith.constant 0 : i32
    %c0_i32_1 = arith.constant 0 : i32
    return %c0_i32, %c0_i32_0 : i32, i32
  }
  func.func @transform_6(%arg0: i32) -> (i32, i32) {
    %c0_i32 = arith.constant 0 : i32
    %c0_i32_0 = arith.constant 0 : i32
    %c0_i32_1 = arith.constant 0 : i32
    return %c0_i32, %c0_i32_0 : i32, i32
  }
  func.func @transform_7(%arg0: i32) -> (i32, i32) {
    %c0_i32 = arith.constant 0 : i32
    %c0_i32_0 = arith.constant 0 : i32
    %c0_i32_1 = arith.constant 0 : i32
    return %c0_i32, %c0_i32_0 : i32, i32
  }
  func.func @transform_8(%arg0: i32) -> (i32, i32, i32) {
    %c0_i32 = arith.constant 0 : i32
    %c0_i32_0 = arith.constant 0 : i32
    %c0_i32_1 = arith.constant 0 : i32
    return %arg0, %c0_i32, %c0_i32_0 : i32, i32, i32
  }
}

</mosaic_0001>

<bundles_post_ra>
// kernel: tpu_custom_call.1
= control target key start
LH: loop header
LB: loop body
LE: loop exit
PB: predicated region body
PF: predicated region fallthrough
CT: control target
= control target key end

     0   :  { %13 = vsyncpa [#allocation4], 0  ;;  %s3259_s0 = inlined_call_operand.hbm [shape: f32[2,64,128], index: 0, kind: input, shape index: {}]   ;;  %s3260_s1 = inlined_call_operand.vmem [shape: f32[6,128], index: 1, kind: input, shape index: {}]   ;;  %s3261_s2 = inlined_call_operand.hbm [shape: f32[9,128], index: 2, kind: input, shape index: {}]   ;;  %s3262_s3 = inlined_call_operand.vmem [shape: bf16[128,128], index: 3, kind: input, shape index: {}]   ;;  %s3263_s4 = inlined_call_operand.vmem [shape: bf16[128,8], index: 4, kind: input, shape index: {}]   ;;  %s3264_s5 = inlined_call_operand.vmem [shape: f32[1,8], index: 5, kind: input, shape index: {}]   ;;  %s3265_s6 = inlined_call_operand.vmem [shape: bf16[8,128], index: 6, kind: input, shape index: {}]   ;;  %s3266_s7 = inlined_call_operand.hbm [shape: bf16[128,128], index: 7, kind: input, shape index: {}]   ;;  %s3267_s8 = inlined_call_operand.hbm [shape: f32[2,64,128], index: 8, kind: output, shape index: {}]  }
   0x1   :  { %15 = vsyncpa [#allocation4 + $0x1], 0 }
   0x2   :  { %16 = vsyncpa [#allocation7], 0 }
   0x3   :  { %17 = vsyncpa [#allocation5], 0 }
   0x4   :  { %19 = vsyncpa [#allocation5 + $0x1], 0  ;;  %s2114_s27 = smov 0   ;;  %s2116_s28 = smov 0  }
   0x5   :  { %s2118_s29 = smov 0   ;;  %s2120_s30 = smov 0  }
   0x6 LB: > { %s2135_s9 = sadd.s32 4294967295, %s2053_s30   ;;  %s1590_s10 = sadd.s32 4294967294, %s2053_s30   ;;  %s2053_s30 = sphi %s2120_s30, %s3339_s30   ;;  %s2049_s29 = sphi %s2118_s29, %s3338_s29   ;;  %s2045_s28 = sphi %s2116_s28, %s3337_s28   ;;  %s2041_s27 = sphi %s2114_s27, %s3336_s27  }
   0x7   : > { %p45_p0 = scmp.ne.s32.totalorder %s2045_s28, %s2041_s27  ;;  %p3268_p1 = scmp.eq.s32.totalorder %s2135_s9, 0 }
   0x8   : > { %p222_p3 = scmp.eq.s32.totalorder %s1590_s10, 1  ;;  %p1591_p5 = scmp.ge.s32.totalorder %s2053_s30, 1 }
   0x9   : > { %p2144_p4 = por %p3268_p1, %p45_p0  ;;  %p229_p7 = scmp.lt.s32.totalorder %s2053_s30, 3 }
   0xa   : > { %p2149_p6 = por %p222_p3, %p45_p0  ;;  %s2055_s14 = smov [#allocation6]  }
   0xb   : > { %s3273_s11 = scalar_select %p2144_p4, 1, 0 }
   0xc   : > { %s3274_s12 = scalar_select %p2149_p6, 1, 0 }
   0xd   : > { %p2154_p8 = pnand %p1591_p5, %p229_p7  ;;  %s244_s15 = sshll.u32 %s2055_s14, 4  ;;  %s2158_s15 = int_to_ptr.vmem [resolvable:$true] %s244_s15 }
   0xe   : > { %s2056_s17 = smov [#allocation8]   ;;  %s1897_s21 = scalar_lea.hbm %s3261_s2, 256 }
   0xf   : > { %p1771_p9 = pneg %p2154_p8  ;;  %s269_s18 = sshll.u32 %s2056_s17, 4  ;;  %s2169_s18 = int_to_ptr.vmem [resolvable:$true] %s269_s18 }
  0x10   : > { %p1898_p12 = scmp.ne.s32.totalorder %s3261_s2, %s1897_s21  ;;  %p1904_p5 = scmp.lt.u32.totalorder %s1897_s21, %s3261_s2 }
  0x11   : > { %p2165_p11 = pnand %p1771_p9, %p3268_p1 }
  0x13   : > { %p1899_p13 = pneg %p2165_p11 }
  0x15   : > { %p1900_p0 = pnand %p1899_p13, %p1898_p12 }
  0x17   : > { %p1901_p3 = pneg %p1900_p0 }
  0x19   : > { %p1906_p7 = pnand %p1904_p5, %p1901_p3 }
  0x1b   : > { %1909 = shalt.err (!%p1906_p7)
}
  0x1c   : > { %s1910_s26 = scalar_lea.vmem %s2158_s15, 256  ;;  %p1918_p2 = scmp.lt.s32.totalorder %s2158_s15, %s2158_s15 }
  0x1d   : > { %p1911_p9 = scmp.ne.s32.totalorder %s2158_s15, %s1910_s26  ;;  %p1919_p12 = scmp.lt.s32.totalorder %s1910_s26, %s1910_s26 }
  0x1f   : > { %p1913_p10 = pnand %p1911_p9, %p1899_p13  ;;  %p1920_p0 = por %p1919_p12, %p1918_p2 }
  0x21   : > { %p1914_p1 = pneg %p1913_p10 }
  0x23   : > { %p1921_p6 = pnand %p1920_p0, %p1914_p1 }
  0x25   : > { %1924 = shalt.err (!%p1921_p6)
}
  0x26   : > { %s3269_s10 = smov 128   ;;  %s3270_s14 = smov 8  }
  0x27   : > { %1774 = dma.hbm_to_vmem [thread:$0]  (!%p2165_p11), %s3261_s2, 256, %s2158_s15, [#allocation7], %s3269_s10, %s3269_s10, %s3270_s14  }
  0x28   : > { %s1925_s22 = scalar_lea.hbm %s3266_s7, 1024 }
  0x29   : > { %p1926_p1 = scmp.ne.s32.totalorder %s3266_s7, %s1925_s22  ;;  %p1932_p10 = scmp.lt.u32.totalorder %s1925_s22, %s3266_s7 }
  0x2b   : > { %p1928_p2 = pnand %p1926_p1, %p1899_p13 }
  0x2d   : > { %p1929_p6 = pneg %p1928_p2 }
  0x2f   : > { %p1934_p3 = pnand %p1932_p10, %p1929_p6 }
  0x31   : > { %1937 = shalt.err (!%p1934_p3)
}
  0x32   : > { %s1938_s15 = scalar_lea.vmem %s2169_s18, 1024  ;;  %p1946_p12 = scmp.lt.s32.totalorder %s2169_s18, %s2169_s18 }
  0x33   : > { %p1939_p5 = scmp.ne.s32.totalorder %s2169_s18, %s1938_s15  ;;  %p1947_p0 = scmp.lt.s32.totalorder %s1938_s15, %s1938_s15 }
  0x35   : > { %p1941_p7 = pnand %p1939_p5, %p1899_p13  ;;  %p1948_p1 = por %p1947_p0, %p1946_p12 }
  0x37   : > { %p1942_p9 = pneg %p1941_p7 }
  0x39   : > { %p1949_p2 = pnand %p1948_p1, %p1942_p9 }
  0x3b   : > { %1952 = shalt.err (!%p1949_p2)
}
  0x3c   : > { %s2059_s17 = smov 64   ;;  %s2060_s19 = smov 4  }
  0x3d   : > { %1777 = dma.hbm_to_vmem [thread:$0]  (!%p2165_p11), %s3266_s7, 1024, %s2169_s18, [#allocation7], %s2059_s17, %s2059_s17, %s2060_s19  }
  0x3e   : > { %s2227_s22 = sadd.s32 1, %s2053_s30   ;;  %s32_s24 = sadd.s32 1, %s2049_s29 }
  0x3f   : > { %s29_s23 = ssub.s32 %s2053_s30, %s2227_s22  ;;  %p39_p6 = scmp.ne.s32.totalorder %s2049_s29, %s2045_s28 }
  0x40   : > { %p30_p13 = scmp.eq.s32.totalorder %s29_s23, 0  ;;  %p40_p10 = scmp.eq.s32.totalorder %s2053_s30, 0 }
  0x41   : > { %p3277_p5 = scmp.eq.s32.totalorder %s2135_s9, 1  ;;  %p1788_p9 = scmp.lt.s32.totalorder %s2053_s30, 2 }
  0x42   : > { %s2236_s25 = scalar_select %p30_p13, %s2049_s29, %s32_s24  }
  0x43   : > { %p41_p3 = por %p40_p10, %p39_p6  ;;  %p2240_p7 = por %p3277_p5, %p39_p6 }
  0x44   : > { %s283_s16 = sand.u32 1, %s2049_s29   ;;  %s1648_s18 = sshll.u32 %s2053_s30, 10 }
  0x45   : > { %s3278_s26 = scalar_select %p2240_p7, 1, 0 }
  0x46   : > { %s1595_s15 = sshll.u32 %s283_s16, 6  ;;  %s2250_s20 = scalar_lea.hbm %s3259_s0, %s1648_s18 }
  0x47   : > { %s287_s21 = scalar_lea.vmem [#allocation3], %s1595_s15  ;;  %p2254_p11 = pnand %p1788_p9, %p41_p3 }
  0x48   : > { %s294_s23 = sshll.u32 %s287_s21, 4  ;;  %s2258_s10 = scalar_lea.sflag [#allocation4], %s283_s16  ;;  %s2252_s23 = int_to_ptr.vmem [resolvable:$true] %s294_s23 }
  0x49   : > { %s1953_s14 = scalar_lea.hbm %s2250_s20, 1024  ;;  %p1955_p0 = pneg %p2254_p11 }
  0x4a   : > { %p1954_p12 = scmp.ne.s32.totalorder %s2250_s20, %s1953_s14  ;;  %s1958_s17 = scalar_lea.hbm %s3259_s0, 2048 }
  0x4b   : > { %p1959_p13 = scmp.lt.u32.totalorder %s2250_s20, %s3259_s0  ;;  %p1960_p6 = scmp.lt.u32.totalorder %s1958_s17, %s1953_s14 }
  0x4c   : > { %p1956_p1 = pnand %p1955_p0, %p1954_p12  ;;  %p1962_p3 = scmp.lt.u32.totalorder %s1953_s14, %s2250_s20 }
  0x4d   : > { %p1961_p10 = por %p1960_p6, %p1959_p13 }
  0x4e   : > { %p1957_p2 = pneg %p1956_p1 }
  0x4f   : > { %p1963_p5 = por %p1962_p3, %p1961_p10 }
  0x51   : > { %p1964_p9 = pnand %p1963_p5, %p1957_p2 }
  0x53   : > { %1967 = shalt.err (!%p1964_p9)
}
  0x54   : > { %s1968_s16 = scalar_lea.vmem %s2252_s23, 1024  ;;  %s2061_s15 = smov [#allocation3]  }
  0x55   : > { %p1969_p12 = scmp.ne.s32.totalorder %s2252_s23, %s1968_s16  ;;  %s1973_s18 = sshll.u32 %s2061_s15, 4  ;;  %s1974_s18 = int_to_ptr.vmem [resolvable:$false] %s1973_s18 }
  0x56   : > { %s1975_s19 = scalar_lea.vmem %s1974_s18, 2048  ;;  %p1976_p4 = scmp.lt.s32.totalorder %s2252_s23, %s1974_s18 }
  0x57   : > { %p1971_p1 = pnand %p1969_p12, %p1955_p0  ;;  %p1977_p13 = scmp.lt.s32.totalorder %s1975_s19, %s1968_s16 }
  0x59   : > { %p1972_p7 = pneg %p1971_p1  ;;  %p1978_p6 = por %p1977_p13, %p1976_p4 }
  0x5b   : > { %p1979_p10 = pnand %p1978_p6, %p1972_p7 }
  0x5d   : > { %1982 = shalt.err (!%p1979_p10)
}
  0x5e   : > { %s3280_s14 = smov 8   ;;  %s3281_s17 = smov 128  }
  0x5f   : > { %1781 = dma.hbm_to_vmem [thread:$0]  (!%p2254_p11), %s2250_s20, 1024, %s2252_s23, %s2258_s10, %s3281_s17, %s3281_s17, %s3280_s14  }
  0x60   : > { %306 = sbr.rel (%p2154_p8) target bundleno = 1351 (0x547), region = 52  ;;  %s2292_s21 = sand.u32 (!%p2154_p8), 1, %s2045_s28  }
  0x61   : > { %s1599_s16 = sshll.u32 (!%p2154_p8), %s2292_s21, 6  ;;  %s309_s15 = scalar_lea.sflag (!%p2154_p8), [#allocation4], %s2292_s21 }
  0x62   : > { %s2298_s24 = scalar_lea.vmem (!%p2154_p8), [#allocation3], %s1599_s16  ;;  %p3282_p4 = scmp.ne.s32.totalorder (!%p2154_p8), %s3273_s11, 0 }
  0x67   : > { %2028 = dma.done.wait (%p3282_p4), %s309_s15, 1024  }
  0x68   : > { %2030 = vsyncadd (%p3282_p4), %s309_s15, 4294966272  ;;  %p3283_p7 = scmp.eq.s32.totalorder %s2135_s9, 0 }
  0x6a   : > { %2032 = dma.done.wait (%p3283_p7), [#allocation7], 1280   ;;  %p3284_p8 = pmov %p3283_p7 }
  0x6b   : > { %v2062_v0 = vmov 0.0   ;;  %v354_v1 = vld [vmem:[%s2298_s24] sm:$0xff]  ;;  %v1603_v2 = vld [vmem:[%s3260_s1] ss:$0 sm:$0xff]  ;;  %v1604_v3 = vld [vmem:[%s3260_s1 + $0x1] ss:$0 sm:$0xff] }
  0x6c   : > { %2034 = vsyncadd (%p3284_p8), [#allocation7], 4294966016  ;;  %392 = vst [vmem:[#allocation2] sm:$0xff] %v2062_v0  ;;  %1709 = vmatprep.subr.bf16.mxu1 %v2062_v0  ;;  %v372_v4 = vmul.f32 %v1603_v2, %v354_v1  ;;  %v355_v5 = vld [vmem:[%s2298_s24 + $0x8] sm:$0xff]  ;;  %v356_v7 = vld [vmem:[%s2298_s24 + $0x10] sm:$0xff]  ;;  %s2063_s23 = smov 32  }
  0x6d   : > { %393 = vst [vmem:[#allocation2 + $0x48] sm:$0xff] %v2062_v0  ;;  %v373_v6 = vmul.f32 %v1603_v2, %v355_v5  ;;  %v357_v8 = vld [vmem:[%s2298_s24 + $0x18] sm:$0xff]  ;;  %v374_v10 = vmul.f32 %v1603_v2, %v356_v7  ;;  %v358_v12 = vld [vmem:[%s2298_s24 + $0x20] sm:$0xff]  ;;  %v359_v13 = vld [vmem:[%s2298_s24 + $0x28] sm:$0xff]  ;;  %s2064_s18 = smov 96   ;;  %s3192_s10 = scalar_lea.vmem [#allocation9], %s1599_s16 }
  0x6e   : > { %v2318_v9 = vadd.f32 %v1604_v3, %v372_v4  ;;  %v375_v11 = vmul.f32 %v1603_v2, %v357_v8  ;;  %v360_v14 = vld [vmem:[%s2298_s24 + $0x30] sm:$0xff]  ;;  %v376_v16 = vmul.f32 %v1603_v2, %v358_v12  ;;  %v377_v17 = vmul.f32 %v1603_v2, %v359_v13  ;;  %v361_v19 = vld [vmem:[%s2298_s24 + $0x38] sm:$0xff]  ;;  %v1838_v59 = vld [vmem:[%s3262_s3 + $0x10] sm:$0xff]   ;;  %s1498_s16 = sshll.u32 %s3192_s10, 4  ;;  %s1649_s20 = sshll.u32 %s2135_s9, 10  ;;  %s3203_s16 = int_to_ptr.vmem [resolvable:$true] %s1498_s16 }
  0x6f   : > { %v2323_v15 = vadd.f32 %v1604_v3, %v373_v6  ;;  %v378_v18 = vmul.f32 %v1603_v2, %v360_v14  ;;  %v2327_v20 = vadd.f32 %v1604_v3, %v374_v10  ;;  %v379_v22 = vmul.f32 %v1603_v2, %v361_v19  ;;  %v1836_v55 = vld [vmem:[%s3262_s3] sm:$0xff]   ;;  %v1837_v58 = vld [vmem:[%s3262_s3 + $0x8] sm:$0xff]   ;;  %v1839_v60 = vld [vmem:[%s3262_s3 + $0x18] sm:$0xff]   ;;  %s1485_s19 = scalar_lea.sflag [#allocation5], %s2292_s21  ;;  %s1983_s14 = scalar_lea.vmem %s3203_s16, 1024 }
  0x70   : > { %394 = vst [vmem:[#allocation2 + $0x8] sm:$0xff] %v2318_v9  ;;  %v2329_v21 = vadd.f32 %v1604_v3, %v375_v11  ;;  %v2332_v23 = vadd.f32 %v1604_v3, %v376_v16  ;;  %v2334_v24 = vadd.f32 %v1604_v3, %v377_v17  ;;  %1685 = vmatprep.subr.bf16.mxu0 %v1836_v55  ;;  %v1840_v1 = vld [vmem:[%s3262_s3 + $0x20] sm:$0xff]   ;;  %v1841_v2 = vld [vmem:[%s3262_s3 + $0x28] sm:$0xff]   ;;  %v1843_v6 = vld [vmem:[%s3262_s3 + $0x38] sm:$0xff]   ;;  %p1984_p11 = scmp.ne.s32.totalorder %s3203_s16, %s1983_s14  ;;  %p3333_p0 = scmp.ne.s32.totalorder %s3278_s26, 0 }
  0x71   : > { %395 = vst [vmem:[#allocation2 + $0x10] sm:$0xff] %v2323_v15  ;;  %v2336_v25 = vadd.f32 %v1604_v3, %v378_v18  ;;  %396 = vst [vmem:[#allocation2 + $0x18] sm:$0xff] %v2327_v20  ;;  %v2340_v26 = vadd.f32 %v1604_v3, %v379_v22  ;;  %1686 = vmatpush3.bf16.msra.mxu0 %v1836_v55  ;;  %v1842_v3 = vld [vmem:[%s3262_s3 + $0x30] sm:$0xff]   ;;  %s2066_s17 = smov [#allocation9]  }
  0x72   : > { %397 = vst [vmem:[#allocation2 + $0x20] sm:$0xff] %v2329_v21  ;;  %398 = vst [vmem:[#allocation2 + $0x28] sm:$0xff] %v2332_v23  ;;  %1687 = vmatprep.subr.bf16.mxu0 %v1837_v58  ;;  %p1985_p2 = pnand %p1984_p11, %p3333_p0  ;;  %s1987_s15 = sshll.u32 %s2066_s17, 4  ;;  %s1988_s15 = int_to_ptr.vmem [resolvable:$false] %s1987_s15 }
  0x73   : > { %399 = vst [vmem:[#allocation2 + $0x30] sm:$0xff] %v2334_v24  ;;  %400 = vst [vmem:[#allocation2 + $0x38] sm:$0xff] %v2336_v25  ;;  %s1989_s11 = scalar_lea.vmem %s1988_s15, 2048  ;;  %p1990_p5 = scmp.lt.s32.totalorder %s3203_s16, %s1988_s15 }
  0x74   : > { %401 = vst [vmem:[#allocation2 + $0x40] sm:$0xff] %v2340_v26  ;;  %p1986_p3 = pneg %p1985_p2  ;;  %p1991_p9 = scmp.lt.s32.totalorder %s1989_s11, %s1983_s14 }
  0x75   : > { %1688 = vmatpush3.bf16.msra.mxu0 %v1837_v58 }
  0x76   : > { %1689 = vmatprep.subr.bf16.mxu0 %v1838_v59  ;;  %p1992_p12 = por %p1991_p9, %p1990_p5 }
  0x77   : > { %v463_v27 = vld [vmem:[#allocation2 + $0x3] sm:$0xff] }
  0x78   : > { %v2346_v28 = vld [vmem:[#allocation2 + $0x4] sm:$0xff]  ;;  %479 = vrot.lane.b32.xlu0 %v463_v27, %s2063_s23  ;;  %v2351_v30 = vld [vmem:[#allocation2 + $0xc] sm:$0xff]  ;;  %v2358_v33 = vld [vmem:[#allocation2 + $0x14] sm:$0xff]  ;;  %p1993_p1 = pnand %p1992_p12, %p1986_p3 }
  0x79   : > { %495 = vrot.lane.b32.xlu1 %v2346_v28, %s2063_s23  ;;  %v464_v29 = vld [vmem:[#allocation2 + $0xb] sm:$0xff]  ;;  %v465_v31 = vld [vmem:[#allocation2 + $0x13] sm:$0xff]  ;;  %v466_v32 = vld [vmem:[#allocation2 + $0x1b] sm:$0xff]  ;;  %1690 = vmatpush3.bf16.msra.mxu0 %v1838_v59 }
  0x7a   : > { %v2360_v34 = vld [vmem:[#allocation2 + $0x1c] sm:$0xff]  ;;  %v471_v35 = vld [vmem:[#allocation2 + $0x5] sm:$0xff]  ;;  %v472_v36 = vld [vmem:[#allocation2 + $0xd] sm:$0xff]  ;;  %1691 = vmatprep.subr.bf16.mxu0 %v1839_v60 }
  0x7b   : > { %v473_v37 = vld [vmem:[#allocation2 + $0x15] sm:$0xff]  ;;  %v474_v38 = vld [vmem:[#allocation2 + $0x1d] sm:$0xff]  ;;  %v646_v39 = vld [vmem:[#allocation2 + $0x7] sm:$0xff] }
  0x7c   : > { %481 = vrot.lane.b32.xlu0 %v464_v29, %s2063_s23  ;;  %v647_v40 = vld [vmem:[#allocation2 + $0xf] sm:$0xff]  ;;  %v648_v41 = vld [vmem:[#allocation2 + $0x17] sm:$0xff]  ;;  %v649_v42 = vld [vmem:[#allocation2 + $0x1f] sm:$0xff] }
  0x7d   : > { %497 = vrot.lane.b32.xlu1 %v2351_v30, %s2063_s23  ;;  %v467_v43 = vld [vmem:[#allocation2 + $0x23] sm:$0xff]  ;;  %v468_v44 = vld [vmem:[#allocation2 + $0x2b] sm:$0xff]  ;;  %v469_v49 = vld [vmem:[#allocation2 + $0x33] sm:$0xff]  ;;  %1692 = vmatpush3.bf16.msra.mxu0 %v1839_v60 }
  0x7e   : > { %v2392_v45 = vld [vmem:[#allocation2 + $0x24] sm:$0xff]  ;;  %v2394_v46 = vld [vmem:[#allocation2 + $0x2c] sm:$0xff]  ;;  %v470_v50 = vld [vmem:[#allocation2 + $0x3b] sm:$0xff]  ;;  %1693 = vmatprep.subr.bf16.mxu0 %v1840_v1 }
  0x7f   : > { %v654_v47 = vld [vmem:[#allocation2 + $0x9] sm:$0xff]  ;;  %v655_v48 = vld [vmem:[#allocation2 + $0x11] sm:$0xff]  ;;  %v2410_v52 = vld [vmem:[#allocation2 + $0x3c] sm:$0xff] }
  0x80   : > { %483 = vrot.lane.b32.xlu0 %v465_v31, %s2063_s23  ;;  %v2408_v51 = vld [vmem:[#allocation2 + $0x34] sm:$0xff]  ;;  %v657_v54 = vld [vmem:[#allocation2 + $0x21] sm:$0xff]  ;;  %v658_v7 = vld [vmem:[#allocation2 + $0x29] sm:$0xff] }
  0x81   : > { %485 = vrot.lane.b32.xlu1 %v466_v32, %s2063_s23  ;;  %v656_v53 = vld [vmem:[#allocation2 + $0x19] sm:$0xff]  ;;  %v475_v56 = vld [vmem:[#allocation2 + $0x25] sm:$0xff]  ;;  %v476_v57 = vld [vmem:[#allocation2 + $0x2d] sm:$0xff]  ;;  %1694 = vmatpush3.bf16.msra.mxu0 %v1840_v1 }
  0x82   : > { %v477_v61 = vld [vmem:[#allocation2 + $0x35] sm:$0xff]  ;;  %v478_v62 = vld [vmem:[#allocation2 + $0x3d] sm:$0xff]  ;;  %v650_v63 = vld [vmem:[#allocation2 + $0x27] sm:$0xff]  ;;  %1695 = vmatprep.subr.bf16.mxu0 %v1841_v2 }
  0x83   : > { %v651_v0 = vld [vmem:[#allocation2 + $0x2f] sm:$0xff]  ;;  %v652_v4 = vld [vmem:[#allocation2 + $0x37] sm:$0xff]  ;;  %v653_v5 = vld [vmem:[#allocation2 + $0x3f] sm:$0xff] }
  0x84   : > { %499 = vrot.lane.b32.xlu0 %v2358_v33, %s2063_s23  ;;  %v659_v8 = vld [vmem:[#allocation2 + $0x31] sm:$0xff]  ;;  %v660_v12 = vld [vmem:[#allocation2 + $0x39] sm:$0xff]  ;;  %v661_v13 = vld [vmem:[#allocation2 + $0x41] sm:$0xff] }
  0x85   : > { %501 = vrot.lane.b32.xlu1 %v2360_v34, %s2063_s23  ;;  %1696 = vmatpush3.bf16.msra.mxu0 %v1841_v2  ;;  %v822_v19 = vld [vmem:[#allocation2 + $0x43] sm:$0xff] }
  0x86   : > { %1697 = vmatprep.subr.bf16.mxu0 %v1842_v3  ;;  %v2486_v22 = vld [vmem:[#allocation2 + $0x44] sm:$0xff] }
  0x87   : > { %v823_v31 = vld [vmem:[#allocation2 + $0x45] sm:$0xff] }
  0x88   : > { %569 = vrot.lane.b32.xlu0 %v471_v35, %s2064_s18 }
  0x89   : > { %571 = vrot.lane.b32.xlu1 %v472_v36, %s2064_s18  ;;  %1698 = vmatpush3.bf16.msra.mxu0 %v1842_v3 }
  0x8a   : > { %1699 = vmatprep.subr.bf16.mxu0 %v1843_v6 }
  0x8c   : > { %585 = vrot.lane.b32.xlu0 %v2346_v28, %s2064_s18 }
  0x8d   : > { %587 = vrot.lane.b32.xlu1 %v2351_v30, %s2064_s18  ;;  %1700 = vmatpush3.bf16.msra.mxu0 %v1843_v6 }
  0x90   : > { %573 = vrot.lane.b32.xlu0 %v473_v37, %s2064_s18 }
  0x91   : > { %575 = vrot.lane.b32.xlu1 %v474_v38, %s2064_s18  ;;  %v402_v38 = vlaneseq }
  0x94   : > { %589 = vrot.lane.b32.xlu0 %v2358_v33, %s2064_s18 }
  0x95   : > { %591 = vrot.lane.b32.xlu1 %v2360_v34, %s2064_s18 }
  0x98   : > { %662 = vrot.lane.b32.xlu0 %v646_v39, %s2063_s23 }
  0x99   : > { %664 = vrot.lane.b32.xlu1 %v647_v40, %s2063_s23 }
  0x9c   : > { %678 = vrot.lane.b32.xlu0 %v2318_v9, %s2063_s23 }
  0x9d   : > { %680 = vrot.lane.b32.xlu1 %v2323_v15, %s2063_s23 }
  0xa0   : > { %666 = vrot.lane.b32.xlu0 %v648_v41, %s2063_s23  ;;  %v2506_v41 = vshrl.u32 %v402_v38, 7 }
  0xa1   : > { %668 = vrot.lane.b32.xlu1 %v649_v42, %s2063_s23 }
  0xa4   : > { %682 = vrot.lane.b32.xlu0 %v2327_v20, %s2063_s23 }
  0xa5   : > { %684 = vrot.lane.b32.xlu1 %v2329_v21, %s2063_s23 }
  0xa8   : > { %487 = vrot.lane.b32.xlu0 %v467_v43, %s2063_s23 }
  0xa9   : > { %489 = vrot.lane.b32.xlu1 %v468_v44, %s2063_s23  ;;  %v404_v44 = vadd.s32 8, %v2506_v41 }
  0xac   : > { %503 = vrot.lane.b32.xlu0 %v2392_v45, %s2063_s23 }
  0xad   : > { %505 = vrot.lane.b32.xlu1 %v2394_v46, %s2063_s23 }
  0xb0   : > { %752 = vrot.lane.b32.xlu0 %v654_v47, %s2064_s18 }
  0xb1   : > { %754 = vrot.lane.b32.xlu1 %v655_v48, %s2064_s18 }
  0xb4   : > { %768 = vrot.lane.b32.xlu0 %v2318_v9, %s2064_s18 }
  0xb5   : > { %770 = vrot.lane.b32.xlu1 %v2323_v15, %s2064_s18 }
  0xb8   : > { %491 = vrot.lane.b32.xlu0 %v469_v49, %s2063_s23  ;;  %v2509_v49 = vand.u32 127, %v402_v38  ;;  %v2590_v38 = vld [vmem:[#allocation6 + $0x3] ss:$0 sm:$0xff] }
  0xb9   : > { %493 = vrot.lane.b32.xlu1 %v470_v50, %s2063_s23  ;;  %v415_v50 = vand.u32 3, %v2506_v41 }
  0xba   : > { %vm413_vm0 = vcmp.lt.s32.totalorder %v2509_v49, 32  ;;  %vm414_vm3 = vcmp.ge.s32.totalorder %v2509_v49, 96 }
  0xbb   : > { %vm423_vm1 = vcmp.eq.s32.totalorder %v415_v50, 0  ;;  %vm439_vm4 = vcmp.eq.s32.totalorder %v415_v50, 3 }
  0xbc   : > { %507 = vrot.lane.b32.xlu0 %v2408_v51, %s2063_s23  ;;  %vm2520_vm5 = vmand %vm413_vm0, %vm423_vm1 }
  0xbd   : > { %509 = vrot.lane.b32.xlu1 %v2410_v52, %s2063_s23  ;;  %vm2544_vm8 = vmand %vm414_vm3, %vm439_vm4 }
  0xc0   : > { %756 = vrot.lane.b32.xlu0 %v656_v53, %s2064_s18  ;;  %v416_v53 = vand.u32 3, %v404_v44 }
  0xc1   : > { %758 = vrot.lane.b32.xlu1 %v657_v54, %s2064_s18 }
  0xc2   : > { %vm424_vm2 = vcmp.eq.s32.totalorder %v416_v53, 0  ;;  %vm440_vm6 = vcmp.eq.s32.totalorder %v416_v53, 3  ;;  %v2671_v53 = vld [vmem:[#allocation6 + $0x6] ss:$0 sm:$0xff] }
  0xc3   : > { %vm2532_vm7 = vmand %vm413_vm0, %vm424_vm2 }
  0xc4   : > { %772 = vrot.lane.b32.xlu0 %v2327_v20, %s2064_s18  ;;  %vm2552_vm9 = vmand %vm414_vm3, %vm440_vm6 }
  0xc5   : > { %774 = vrot.lane.b32.xlu1 %v2329_v21, %s2064_s18 }
  0xc8   : > { %577 = vrot.lane.b32.xlu0 %v475_v56, %s2064_s18 }
  0xc9   : > { %579 = vrot.lane.b32.xlu1 %v476_v57, %s2064_s18 }
  0xcc   : > { %593 = vrot.lane.b32.xlu0 %v2392_v45, %s2064_s18 }
  0xcd   : > { %595 = vrot.lane.b32.xlu1 %v2394_v46, %s2064_s18 }
  0xd0   : > { %581 = vrot.lane.b32.xlu0 %v477_v61, %s2064_s18 }
  0xd1   : > { %583 = vrot.lane.b32.xlu1 %v478_v62, %s2064_s18  ;;  %v405_v62 = vadd.s32 16, %v2506_v41 }
  0xd4   : > { %597 = vrot.lane.b32.xlu0 %v2408_v51, %s2064_s18 }
  0xd5   : > { %599 = vrot.lane.b32.xlu1 %v2410_v52, %s2064_s18 }
  0xd8   : > { %670 = vrot.lane.b32.xlu0 %v650_v63, %s2063_s23  ;;  %v406_v63 = vadd.s32 24, %v2506_v41 }
  0xd9   : > { %672 = vrot.lane.b32.xlu1 %v651_v0, %s2063_s23 }
  0xdc   : > { %686 = vrot.lane.b32.xlu0 %v2332_v23, %s2063_s23 }
  0xdd   : > { %688 = vrot.lane.b32.xlu1 %v2334_v24, %s2063_s23 }
  0xe0   : > { %674 = vrot.lane.b32.xlu0 %v652_v4, %s2063_s23  ;;  %v2560_v4 = vld [vmem:[#allocation6 + $0x1] ss:$0 sm:$0xff] }
  0xe1   : > { %676 = vrot.lane.b32.xlu1 %v653_v5, %s2063_s23  ;;  %v2562_v5 = vld [vmem:[#allocation6] ss:$0 sm:$0xff] }
  0xe4   : > { %690 = vrot.lane.b32.xlu0 %v2336_v25, %s2063_s23 }
  0xe5   : > { %692 = vrot.lane.b32.xlu1 %v2340_v26, %s2063_s23 }
  0xe8   : > { %760 = vrot.lane.b32.xlu0 %v658_v7, %s2064_s18 }
  0xe9   : > { %762 = vrot.lane.b32.xlu1 %v659_v8, %s2064_s18 }
  0xea   : > { %v480_v10 = vpop.permute.xlu0 %479 }
  0xeb   : > { %v496_v11 = vpop.permute.xlu1 %495 }
  0xec   : > { %776 = vrot.lane.b32.xlu0 %v2332_v23, %s2064_s18  ;;  %v511_v59 = vsel %vm413_vm0, %v480_v10, %v496_v11 }
  0xed   : > { %778 = vrot.lane.b32.xlu1 %v2334_v24, %s2064_s18  ;;  %v519_v6 = vsel %vm2520_vm5, 0.0, %v511_v59  ;;  %v2608_v59 = vld [vmem:[#allocation6 + $0x7] ss:$0 sm:$0xff] }
  0xee   : > { %v482_v14 = vpop.permute.xlu0 %481 }
  0xef   : > { %v498_v16 = vpop.permute.xlu1 %497 }
  0xf0   : > { %764 = vrot.lane.b32.xlu0 %v660_v12, %s2064_s18  ;;  %v2538_v61 = vsel %vm413_vm0, %v482_v14, %v498_v16  ;;  %v418_v14 = vand.u32 3, %v406_v63  ;;  %v2577_v16 = vld [vmem:[#allocation6 + $0x2] ss:$0 sm:$0xff] }
  0xf1   : > { %766 = vrot.lane.b32.xlu1 %v661_v13, %s2064_s18  ;;  %v520_v7 = vsel %vm2532_vm7, 0.0, %v2538_v61  ;;  %v417_v13 = vand.u32 3, %v405_v62 }
  0xf2   : > { %v2478_v17 = vpop.permute.xlu0 %483  ;;  %vm2604_vm11 = vcmp.eq.s32.totalorder %v418_v14, 0  ;;  %vm2656_vm1 = vcmp.eq.s32.totalorder %v418_v14, 3 }
  0xf3   : > { %v2480_v18 = vpop.permute.xlu1 %485  ;;  %vm425_vm10 = vcmp.eq.s32.totalorder %v417_v13, 0  ;;  %vm441_vm12 = vcmp.eq.s32.totalorder %v417_v13, 3  ;;  %v555_v13 = vmul.f32 %v2560_v4, %v2358_v33  ;;  %vm2636_vm14 = vmand %vm413_vm0, %vm2604_vm11 }
  0xf4   : > { %780 = vrot.lane.b32.xlu0 %v2336_v25, %s2064_s18  ;;  %vm2618_vm13 = vmand %vm413_vm0, %vm425_vm10 }
  0xf5   : > { %782 = vrot.lane.b32.xlu1 %v2340_v26, %s2064_s18  ;;  %vm2648_vm15 = vmand %vm414_vm3, %vm441_vm12 }
  0xf6   : > { %v2488_v27 = vpop.permute.xlu0 %499  ;;  %vm2692_vm2 = vmand %vm414_vm3, %vm2656_vm1 }
  0xf7   : > { %v2490_v29 = vpop.permute.xlu1 %501 }
  0xf8   : > { %824 = vrot.lane.b32.xlu0 %v822_v19, %s2063_s23 }
  0xf9   : > { %826 = vrot.lane.b32.xlu1 %v2486_v22, %s2063_s23 }
  0xfa   : > { %v570_v32 = vpop.permute.xlu0 %569 }
  0xfb   : > { %v572_v35 = vpop.permute.xlu1 %571 }
  0xfc   : > { %879 = vrot.lane.b32.xlu0 %v823_v31, %s2064_s18 }
  0xfd   : > { %881 = vrot.lane.b32.xlu1 %v2486_v22, %s2064_s18  ;;  %s3211_s18 = scalar_lea.hbm %s3267_s8, %s1649_s20 }
  0xfe   : > { %v586_v25 = vpop.permute.xlu0 %585 }
  0xff   : > { %v588_v26 = vpop.permute.xlu1 %587  ;;  %v601_v1 = vsel %vm414_vm3, %v570_v32, %v586_v25  ;;  %v553_v32 = vmul.f32 %v2560_v4, %v2346_v28  ;;  %v532_v25 = vmul.f32 %v2562_v5, %v519_v6  ;;  %v2600_v28 = vld [vmem:[#allocation6 + $0x4] ss:$0 sm:$0xff] }
 0x100   : > { %v2558_v3 = vsel %vm414_vm3, %v572_v35, %v588_v26  ;;  %v609_v19 = vsel %vm2544_vm8, 0.0, %v601_v1  ;;  %v554_v35 = vmul.f32 %v2560_v4, %v2351_v30  ;;  %v533_v26 = vmul.f32 %v2562_v5, %v520_v7 }
 0x101   : > { %v610_v31 = vsel %vm2552_vm9, 0.0, %v2558_v3  ;;  %v561_v62 = vadd.f32 %v553_v32, %v532_v25  ;;  %v736_v7 = vmul.f32 %v2600_v28, %v2318_v9  ;;  %v513_v32 = vsel %vm413_vm0, %v2478_v17, %v2488_v27 }
 0x102   : > { %v2498_v36 = vpop.permute.xlu0 %573  ;;  %v623_v50 = vmul.f32 %v2577_v16, %v610_v31  ;;  %v562_v63 = vadd.f32 %v554_v35, %v533_v26  ;;  %v863_v9 = vmul.f32 %v2608_v59, %v2351_v30  ;;  %v2644_v17 = vsel %vm413_vm0, %v2480_v18, %v2490_v29 }
 0x103   : > { %v2500_v37 = vpop.permute.xlu1 %575  ;;  %v556_v18 = vmul.f32 %v2560_v4, %v2360_v34  ;;  %v829_v29 = vsel %vm2520_vm5, 0.0, %v2538_v61 }
 0x104   : > { %v631_v25 = vadd.f32 %v623_v50, %v562_v63  ;;  %v830_v50 = vsel %vm2532_vm7, 0.0, %v513_v32 }
 0x106   : > { %v2502_v39 = vpop.permute.xlu0 %589 }
 0x107   : > { %v2504_v40 = vpop.permute.xlu1 %591 }
 0x108   : > { %v2680_v56 = vsel %vm414_vm3, %v2500_v37, %v2504_v40 }
 0x10a   : > { %v663_v42 = vpop.permute.xlu0 %662 }
 0x10b   : > { %v665_v43 = vpop.permute.xlu1 %664 }
 0x10e   : > { %v679_v47 = vpop.permute.xlu0 %678 }
 0x10f   : > { %v681_v48 = vpop.permute.xlu1 %680  ;;  %v694_v11 = vsel %vm413_vm0, %v663_v42, %v679_v47 }
 0x110   : > { %v695_v12 = vsel %vm413_vm0, %v665_v43, %v681_v48  ;;  %v702_v42 = vsel %vm2520_vm5, 0.0, %v694_v11  ;;  %v622_v48 = vmul.f32 %v2577_v16, %v609_v19  ;;  %v737_v19 = vmul.f32 %v2600_v28, %v2323_v15 }
 0x111   : > { %v703_v43 = vsel %vm2532_vm7, 0.0, %v695_v12  ;;  %v715_v1 = vmul.f32 %v2590_v38, %v702_v42  ;;  %v864_v15 = vmul.f32 %v2608_v59, %v2358_v33  ;;  %v603_v33 = vsel %vm414_vm3, %v2498_v36, %v2502_v39  ;;  %v2669_v36 = vld [vmem:[#allocation6 + $0x5] ss:$0 sm:$0xff] }
 0x112   : > { %v2512_v54 = vpop.permute.xlu0 %666  ;;  %v716_v6 = vmul.f32 %v2590_v38, %v703_v43  ;;  %v630_v35 = vadd.f32 %v622_v48, %v561_v62  ;;  %v521_v48 = vsel %vm2618_vm13, 0.0, %v513_v32  ;;  %v522_v62 = vsel %vm2636_vm14, 0.0, %v2644_v17 }
 0x113   : > { %v2514_v55 = vpop.permute.xlu1 %668  ;;  %v611_v63 = vsel %vm2648_vm15, 0.0, %v603_v33  ;;  %v534_v27 = vmul.f32 %v2562_v5, %v521_v48  ;;  %v2723_v48 = vld [vmem:[#allocation6 + $0x8] ss:$0 sm:$0xff] }
 0x114   : > { %v723_v42 = vadd.f32 %v715_v1, %v630_v35  ;;  %v724_v43 = vadd.f32 %v716_v6, %v631_v25  ;;  %v842_v25 = vmul.f32 %v2671_v53, %v829_v29  ;;  %v535_v29 = vmul.f32 %v2562_v5, %v522_v62 }
 0x116   : > { %v2524_v57 = vpop.permute.xlu0 %682  ;;  %v745_v32 = vadd.f32 %v737_v19, %v724_v43 }
 0x117   : > { %v2526_v58 = vpop.permute.xlu1 %684  ;;  %v696_v37 = vsel %vm413_vm0, %v2512_v54, %v2524_v57 }
 0x118   : > { %v697_v54 = vsel %vm413_vm0, %v2514_v55, %v2526_v58  ;;  %v704_v19 = vsel %vm2618_vm13, 0.0, %v696_v37  ;;  %v884_v55 = vsel %vm2544_vm8, 0.0, %v2558_v3  ;;  %v624_v58 = vmul.f32 %v2577_v16, %v611_v63 }
 0x119   : > { %v717_v62 = vmul.f32 %v2590_v38, %v704_v19  ;;  %v897_v0 = vmul.f32 %v2723_v48, %v884_v55  ;;  %v564_v63 = vadd.f32 %v556_v18, %v535_v29  ;;  %v739_v18 = vmul.f32 %v2600_v28, %v2329_v21 }
 0x11a   : > { %v2569_v8 = vpop.permute.xlu0 %487 }
 0x11b   : > { %v2571_v10 = vpop.permute.xlu1 %489 }
 0x11e   : > { %v2596_v44 = vpop.permute.xlu0 %503 }
 0x11f   : > { %v2598_v47 = vpop.permute.xlu1 %505  ;;  %v2761_v29 = vsel %vm413_vm0, %v2569_v8, %v2596_v44 }
 0x122   : > { %v753_v11 = vpop.permute.xlu0 %752 }
 0x123   : > { %v755_v12 = vpop.permute.xlu1 %754 }
 0x126   : > { %v769_v39 = vpop.permute.xlu0 %768 }
 0x127   : > { %v771_v14 = vpop.permute.xlu1 %770  ;;  %v784_v60 = vsel %vm414_vm3, %v753_v11, %v769_v39  ;;  %v744_v11 = vadd.f32 %v736_v7, %v723_v42  ;;  %v843_v39 = vmul.f32 %v2671_v53, %v830_v50  ;;  %v612_v7 = vsel %vm2692_vm2, 0.0, %v2680_v56 }
 0x128   : > { %v785_v61 = vsel %vm414_vm3, %v755_v12, %v771_v14  ;;  %v792_v40 = vsel %vm2544_vm8, 0.0, %v784_v60  ;;  %v885_v50 = vsel %vm2552_vm9, 0.0, %v603_v33  ;;  %v705_v60 = vsel %vm2636_vm14, 0.0, %v697_v54 }
 0x129   : > { %v793_v6 = vsel %vm2552_vm9, 0.0, %v785_v61  ;;  %v805_v12 = vmul.f32 %v2669_v36, %v792_v40  ;;  %v563_v40 = vadd.f32 %v555_v13, %v534_v27  ;;  %v898_v3 = vmul.f32 %v2723_v48, %v885_v50  ;;  %v2745_v13 = vld [vmem:[%s3260_s1 + $0x2] ss:$0 sm:$0xff] }
 0x12a   : > { %v806_v35 = vmul.f32 %v2669_v36, %v793_v6  ;;  %v2713_v57 = vpop.permute.xlu0 %491  ;;  %v625_v6 = vmul.f32 %v2577_v16, %v612_v7 }
 0x12b   : > { %v2715_v14 = vpop.permute.xlu1 %493  ;;  %v813_v42 = vadd.f32 %v805_v12, %v744_v11 }
 0x12c   : > { %v814_v43 = vadd.f32 %v806_v35, %v745_v32  ;;  %v632_v32 = vadd.f32 %v624_v58, %v563_v40  ;;  %v718_v35 = vmul.f32 %v2590_v38, %v705_v60  ;;  %v633_v54 = vadd.f32 %v625_v6, %v564_v63 }
 0x12d   : > { %v850_v61 = vadd.f32 %v842_v25, %v813_v42  ;;  %v831_v58 = vsel %vm2618_vm13, 0.0, %v2644_v17  ;;  %v832_v40 = vsel %vm2636_vm14, 0.0, %v2761_v29 }
 0x12e   : > { %v851_v37 = vadd.f32 %v843_v39, %v814_v43  ;;  %v2735_v11 = vpop.permute.xlu0 %507  ;;  %v738_v39 = vmul.f32 %v2600_v28, %v2327_v20  ;;  %v725_v7 = vadd.f32 %v717_v62, %v632_v32  ;;  %v726_v43 = vadd.f32 %v718_v35, %v633_v54 }
 0x12f   : > { %v2737_v12 = vpop.permute.xlu1 %509  ;;  %v871_v2 = vadd.f32 %v863_v9, %v850_v61  ;;  %v844_v26 = vmul.f32 %v2671_v53, %v831_v58  ;;  %v845_v35 = vmul.f32 %v2671_v53, %v832_v40  ;;  %v886_v54 = vsel %vm2648_vm15, 0.0, %v2680_v56 }
 0x130   : > { %v872_v33 = vadd.f32 %v864_v15, %v851_v37  ;;  %v746_v50 = vadd.f32 %v738_v39, %v725_v7  ;;  %v747_v17 = vadd.f32 %v739_v18, %v726_v43 }
 0x131   : > { %v905_v25 = vadd.f32 %v897_v0, %v871_v2 }
 0x132   : > { %v906_v27 = vadd.f32 %v898_v3, %v872_v33  ;;  %v757_v19 = vpop.permute.xlu0 %756  ;;  %v865_v33 = vmul.f32 %v2608_v59, %v2360_v34  ;;  %v866_v34 = vmul.f32 %v2608_v59, %v2392_v45 }
 0x133   : > { %v759_v42 = vpop.permute.xlu1 %758  ;;  %v2750_v9 = vadd.f32 %v2745_v13, %v905_v25 }
 0x134   : > { %v2753_v15 = vadd.f32 %v2745_v13, %v906_v27 }
 0x135   : > { %v933_v20 = vmul.f32 0.044715, %v2750_v9 }
 0x136   : > { %v934_v55 = vmul.f32 0.044715, %v2753_v15  ;;  %v773_v60 = vpop.permute.xlu0 %772 }
 0x137   : > { %v775_v61 = vpop.permute.xlu1 %774  ;;  %v786_v21 = vsel %vm414_vm3, %v757_v19, %v773_v60  ;;  %v941_v8 = vmul.f32 %v933_v20, %v2750_v9  ;;  %v407_v60 = vadd.s32 32, %v2506_v41 }
 0x138   : > { %v787_v37 = vsel %vm414_vm3, %v759_v42, %v775_v61  ;;  %v942_v44 = vmul.f32 %v934_v55, %v2753_v15  ;;  %v794_v31 = vsel %vm2648_vm15, 0.0, %v786_v21  ;;  %v899_v55 = vmul.f32 %v2723_v48, %v886_v54 }
 0x139   : > { %v795_v6 = vsel %vm2692_vm2, 0.0, %v787_v37  ;;  %v807_v62 = vmul.f32 %v2669_v36, %v794_v31  ;;  %v949_v3 = vmul.f32 %v941_v8, %v2750_v9  ;;  %v408_v8 = vadd.s32 40, %v2506_v41 }
 0x13a   : > { %v808_v0 = vmul.f32 %v2669_v36, %v795_v6  ;;  %v950_v2 = vmul.f32 %v942_v44, %v2753_v15  ;;  %v578_v63 = vpop.permute.xlu0 %577  ;;  %v419_v1 = vand.u32 3, %v407_v60 }
 0x13b   : > { %v2788_v32 = vpop.permute.xlu1 %579  ;;  %v815_v25 = vadd.f32 %v807_v62, %v746_v50  ;;  %v957_v39 = vadd.f32 %v949_v3, %v2750_v9  ;;  %v420_v62 = vand.u32 3, %v408_v8 }
 0x13c   : > { %v816_v27 = vadd.f32 %v808_v0, %v747_v17  ;;  %v958_v7 = vadd.f32 %v950_v2, %v2753_v15  ;;  %v409_v0 = vadd.s32 48, %v2506_v41  ;;  %vm427_vm4 = vcmp.eq.s32.totalorder %v419_v1, 0 }
 0x13d   : > { %v852_v19 = vadd.f32 %v844_v26, %v815_v25  ;;  %v965_v20 = vmul.f32 0.7978846, %v957_v39  ;;  %vm428_vm5 = vcmp.eq.s32.totalorder %v420_v62, 0  ;;  %vm2829_vm6 = vcmp.eq.s32.totalorder %v419_v1, 3  ;;  %vm2837_vm7 = vmand %vm413_vm0, %vm427_vm4 }
 0x13e   : > { %v853_v42 = vadd.f32 %v845_v35, %v816_v27  ;;  %v594_v18 = vpop.permute.xlu0 %593  ;;  %v966_v56 = vmul.f32 0.7978846, %v958_v7  ;;  %v421_v35 = vand.u32 3, %v409_v0  ;;  %vm2841_vm8 = vcmp.eq.s32.totalorder %v420_v62, 3  ;;  %vm2849_vm9 = vmand %vm413_vm0, %vm428_vm5 }
 0x13f   : > { %v596_v43 = vpop.permute.xlu1 %595  ;;  %v873_v58 = vadd.f32 %v865_v33, %v852_v19  ;;  %v2801_v50 = vsel %vm414_vm3, %v578_v63, %v594_v18  ;;  %1860 = vtanh.f32 %v965_v20  ;;  %v410_v63 = vadd.s32 56, %v2506_v41  ;;  %vm2870_vm11 = vmand %vm414_vm3, %vm2829_vm6 }
 0x140   : > { %v887_v30 = vsel %vm2692_vm2, 0.0, %v2801_v50  ;;  %v874_v21 = vadd.f32 %v866_v34, %v853_v42  ;;  %1862 = vtanh.f32 %v966_v56  ;;  %v557_v19 = vmul.f32 %v2560_v4, %v2392_v45  ;;  %vm2880_vm12 = vmand %vm414_vm3, %vm2841_vm8 }
 0x141   : > { %v907_v61 = vadd.f32 %v899_v55, %v873_v58  ;;  %v900_v37 = vmul.f32 %v2723_v48, %v887_v30  ;;  %v2857_v45 = vsel %vm413_vm0, %v2571_v10, %v2598_v47  ;;  %v422_v30 = vand.u32 3, %v410_v63 }
 0x142   : > { %v2809_v44 = vpop.permute.xlu0 %581  ;;  %v925_v56 = vmul.f32 0.5, %v2750_v9  ;;  %vm2862_vm10 = vcmp.eq.s32.totalorder %v421_v35, 0  ;;  %v2887_v62 = vsel %vm414_vm3, %v2788_v32, %v596_v43  ;;  %v926_v0 = vmul.f32 0.5, %v2753_v15 }
 0x143   : > { %v2811_v40 = vpop.permute.xlu1 %583  ;;  %v2814_v31 = vadd.f32 %v2745_v13, %v907_v61  ;;  %v908_v17 = vadd.f32 %v900_v37, %v874_v21  ;;  %v558_v21 = vmul.f32 %v2560_v4, %v2394_v46  ;;  %v523_v63 = vsel %vm2837_vm7, 0.0, %v2761_v29  ;;  %vm2908_vm14 = vmand %vm413_vm0, %vm2862_vm10 }
 0x144   : > { %vm2896_vm13 = vcmp.eq.s32.totalorder %v422_v30, 0  ;;  %v2916_v18 = vsel %vm413_vm0, %v2713_v57, %v2735_v11  ;;  %vm2935_vm15 = vcmp.eq.s32.totalorder %v421_v35, 3  ;;  %v2953_v35 = vsel %vm413_vm0, %v2715_v14, %v2737_v12 }
 0x145   : > { %v2817_v6 = vadd.f32 %v2745_v13, %v908_v17  ;;  %v935_v33 = vmul.f32 0.044715, %v2814_v31  ;;  %vm2945_vm1 = vmand %vm413_vm0, %vm2896_vm13  ;;  %vm2955_vm2 = vcmp.eq.s32.totalorder %v422_v30, 3  ;;  %vm1265_vm6 = vcmask 64512  }
 0x146   : > { %v2820_v3 = vpop.permute.xlu0 %597  ;;  %vm2970_vm4 = vmand %vm414_vm3, %vm2935_vm15  ;;  %v526_v30 = vsel %vm2945_vm1, 0.0, %v2953_v35 }
 0x147   : > { %v2822_v2 = vpop.permute.xlu1 %599  ;;  %v936_v26 = vmul.f32 0.044715, %v2817_v6  ;;  %v943_v39 = vmul.f32 %v935_v33, %v2814_v31  ;;  %vm3000_vm5 = vmand %vm414_vm3, %vm2955_vm2 }
 0x149   : > { %v944_v54 = vmul.f32 %v936_v26, %v2817_v6  ;;  %v1861_v34 = vpop.eup %1860  ;;  %v951_v20 = vmul.f32 %v943_v39, %v2814_v31  ;;  %v524_v39 = vsel %vm2849_vm9, 0.0, %v2857_v45 }
 0x14a   : > { %v671_v25 = vpop.permute.xlu0 %670  ;;  %v981_v60 = vadd.f32 1.0, %v1861_v34  ;;  %v1863_v61 = vpop.eup %1862  ;;  %v741_v34 = vmul.f32 %v2600_v28, %v2334_v24  ;;  %v833_v24 = vsel %vm2837_vm7, 0.0, %v2857_v45 }
 0x14b   : > { %v673_v27 = vpop.permute.xlu1 %672  ;;  %v952_v55 = vmul.f32 %v944_v54, %v2817_v6  ;;  %v959_v9 = vadd.f32 %v951_v20, %v2814_v31  ;;  %v982_v33 = vadd.f32 1.0, %v1863_v61 }
 0x14c   : > { %v989_v26 = vmul.f32 %v981_v60, %v925_v56  ;;  %v536_v56 = vmul.f32 %v2562_v5, %v523_v63  ;;  %v537_v60 = vmul.f32 %v2562_v5, %v524_v39 }
 0x14d   : > { %v960_v17 = vadd.f32 %v952_v55, %v2817_v6  ;;  %v967_v54 = vmul.f32 0.7978846, %v959_v9  ;;  %v990_v43 = vmul.f32 %v982_v33, %v926_v0  ;;  %v740_v9 = vmul.f32 %v2600_v28, %v2332_v23 }
 0x14e   : > { %v687_v10 = vpop.permute.xlu0 %686  ;;  %v566_v63 = vadd.f32 %v558_v21, %v537_v60  ;;  %v846_v60 = vmul.f32 %v2671_v53, %v833_v24  ;;  %v888_v24 = vsel %vm2870_vm11, 0.0, %v2887_v62 }
 0x14f   : > { %v689_v47 = vpop.permute.xlu1 %688  ;;  %v968_v7 = vmul.f32 0.7978846, %v960_v17  ;;  %v698_v32 = vsel %vm413_vm0, %v671_v25, %v687_v10  ;;  %v613_v25 = vsel %vm2870_vm11, 0.0, %v2801_v50  ;;  %1864 = vtanh.f32 %v967_v54 }
 0x150   : > { %v699_v15 = vsel %vm413_vm0, %v673_v27, %v689_v47  ;;  %v614_v27 = vsel %vm2880_vm12, 0.0, %v2887_v62  ;;  %v997_v61 = vpack.c.bf16 %v990_v43, %v989_v26  ;;  %v706_v57 = vsel %vm2837_vm7, 0.0, %v698_v32 }
 0x151   : > { %1866 = vtanh.f32 %v968_v7  ;;  %v707_v11 = vsel %vm2849_vm9, 0.0, %v699_v15  ;;  %v525_v50 = vsel %vm2908_vm14, 0.0, %v2916_v18  ;;  %v626_v37 = vmul.f32 %v2577_v16, %v613_v25 }
 0x152   : > { %v675_v20 = vpop.permute.xlu0 %674  ;;  %v627_v10 = vmul.f32 %v2577_v16, %v614_v27  ;;  %1701 = vmatprep.mubr.bf16.mxu0 %v997_v61  ;;  %v565_v26 = vadd.f32 %v557_v19, %v536_v56  ;;  %v719_v39 = vmul.f32 %v2590_v38, %v706_v57  ;;  %v720_v54 = vmul.f32 %v2590_v38, %v707_v11 }
 0x153   : > { %v677_v55 = vpop.permute.xlu1 %676  ;;  %v559_v7 = vmul.f32 %v2560_v4, %v2408_v51  ;;  %v538_v14 = vmul.f32 %v2562_v5, %v525_v50  ;;  %v2978_v19 = vsel %vm414_vm3, %v2809_v44, %v2820_v3  ;;  %v2988_v15 = vmul.f32 %v2608_v59, %v2394_v46 }
 0x154   : > { %v634_v21 = vadd.f32 %v626_v37, %v565_v26  ;;  %v635_v32 = vadd.f32 %v627_v10, %v566_v63  ;;  %v2992_v43 = vmul.f32 %v2608_v59, %v2408_v51  ;;  %v560_v44 = vmul.f32 %v2560_v4, %v2410_v52 }
 0x155   : > { %v3008_v46 = vsel %vm414_vm3, %v2811_v40, %v2822_v2  ;;  %v615_v4 = vsel %vm2970_vm4, 0.0, %v2978_v19  ;;  %v567_v61 = vadd.f32 %v559_v7, %v538_v14  ;;  %v834_v40 = vsel %vm2849_vm9, 0.0, %v2916_v18 }
 0x156   : > { %v691_v33 = vpop.permute.xlu0 %690  ;;  %v727_v45 = vadd.f32 %v719_v39, %v634_v21  ;;  %v728_v25 = vadd.f32 %v720_v54, %v635_v32  ;;  %v539_v2 = vmul.f32 %v2562_v5, %v526_v30  ;;  %v616_v11 = vsel %vm3000_vm5, 0.0, %v3008_v46 }
 0x157   : > { %v693_v23 = vpop.permute.xlu1 %692  ;;  %v700_v27 = vsel %vm413_vm0, %v675_v20, %v691_v33  ;;  %v927_v50 = vmul.f32 0.5, %v2814_v31  ;;  %v928_v37 = vmul.f32 0.5, %v2817_v6  ;;  %v628_v10 = vmul.f32 %v2577_v16, %v615_v4 }
 0x158   : > { %v708_v47 = vsel %vm2908_vm14, 0.0, %v700_v27  ;;  %v701_v58 = vsel %vm413_vm0, %v677_v55, %v693_v23  ;;  %v748_v33 = vadd.f32 %v740_v9, %v727_v45  ;;  %v749_v63 = vadd.f32 %v741_v34, %v728_v25 }
 0x159   : > { %v1865_v56 = vpop.eup %1864  ;;  %v721_v55 = vmul.f32 %v2590_v38, %v708_v47  ;;  %v709_v9 = vsel %vm2945_vm1, 0.0, %v701_v58  ;;  %v847_v14 = vmul.f32 %v2671_v53, %v834_v40  ;;  %v629_v30 = vmul.f32 %v2577_v16, %v616_v11  ;;  %v3052_v40 = vld [vmem:[#allocation2 + $0x38] sm:$0xff]  ;;  %v3056_v11 = vld [vmem:[#allocation2 + $0x40] sm:$0xff] }
 0x15a   : > { %v761_v42 = vpop.permute.xlu0 %760  ;;  %v983_v20 = vadd.f32 1.0, %v1865_v56  ;;  %v889_v4 = vsel %vm2880_vm12, 0.0, %v2978_v19  ;;  %v568_v27 = vadd.f32 %v560_v44, %v539_v2  ;;  %v722_v56 = vmul.f32 %v2590_v38, %v709_v9 }
 0x15b   : > { %v763_v51 = vpop.permute.xlu1 %762  ;;  %v1867_v57 = vpop.eup %1866  ;;  %v742_v8 = vmul.f32 %v3052_v40, %v2600_v28  ;;  %v743_v1 = vmul.f32 %v3056_v11, %v2600_v28  ;;  %v901_v19 = vmul.f32 %v2723_v48, %v888_v24  ;;  %v902_v44 = vmul.f32 %v2723_v48, %v889_v4 }
 0x15c   : > { %v984_v0 = vadd.f32 1.0, %v1867_v57  ;;  %v991_v54 = vmul.f32 %v983_v20, %v927_v50  ;;  %v835_v28 = vsel %vm2908_vm14, 0.0, %v2953_v35 }
 0x15d   : > { %v848_v35 = vmul.f32 %v2671_v53, %v835_v28 }
 0x15e   : > { %v777_v18 = vpop.permute.xlu0 %776  ;;  %v992_v7 = vmul.f32 %v984_v0, %v928_v37  ;;  %v869_v0 = vmul.f32 %v2608_v59, %v2410_v52  ;;  %v870_v52 = vmul.f32 %v2608_v59, %v2486_v22 }
 0x15f   : > { %v779_v5 = vpop.permute.xlu1 %778  ;;  %v788_v26 = vsel %vm414_vm3, %v761_v42, %v777_v18 }
 0x160   : > { %v789_v31 = vsel %vm414_vm3, %v763_v51, %v779_v5  ;;  %v796_v6 = vsel %vm2870_vm11, 0.0, %v788_v26  ;;  %v998_v42 = vpack.c.bf16 %v992_v7, %v991_v54  ;;  %v636_v51 = vadd.f32 %v628_v10, %v567_v61 }
 0x161   : > { %v797_v39 = vsel %vm2880_vm12, 0.0, %v789_v31  ;;  %v809_v23 = vmul.f32 %v2669_v36, %v796_v6  ;;  %v637_v61 = vadd.f32 %v629_v30, %v568_v27 }
 0x162   : > { %v810_v34 = vmul.f32 %v2669_v36, %v797_v39  ;;  %v765_v21 = vpop.permute.xlu0 %764  ;;  %1702 = vmatmul.mubr.bf16.vlgmr.msra.gmra.mrb[0].mxu0 %v998_v42  ;;  %v729_v16 = vadd.f32 %v721_v55, %v636_v51  ;;  %v890_v39 = vsel %vm2970_vm4, 0.0, %v3008_v46 }
 0x163   : > { %v767_v32 = vpop.permute.xlu1 %766  ;;  %v817_v45 = vadd.f32 %v809_v23, %v748_v33  ;;  %v730_v10 = vadd.f32 %v722_v56, %v637_v61  ;;  %v903_v12 = vmul.f32 %v2723_v48, %v890_v39  ;;  %v1845_v39 = vld [vmem:[%s3263_s4 + $0x8] sm:$0xff]  }
 0x164   : > { %v818_v25 = vadd.f32 %v810_v34, %v749_v63 }
 0x165   : > { %v854_v62 = vadd.f32 %v846_v60, %v817_v45  ;;  %v751_v54 = vadd.f32 %v743_v1, %v730_v10 }
 0x166   : > { %v855_v57 = vadd.f32 %v847_v14, %v818_v25  ;;  %v781_v38 = vpop.permute.xlu0 %780 }
 0x167   : > { %v783_v2 = vpop.permute.xlu1 %782  ;;  %v875_v50 = vadd.f32 %v2988_v15, %v854_v62  ;;  %v790_v60 = vsel %vm414_vm3, %v765_v21, %v781_v38 }
 0x168   : > { %v876_v37 = vadd.f32 %v2992_v43, %v855_v57  ;;  %v791_v20 = vsel %vm414_vm3, %v767_v32, %v783_v2  ;;  %v798_v47 = vsel %vm2970_vm4, 0.0, %v790_v60  ;;  %v750_v43 = vadd.f32 %v742_v8, %v729_v16 }
 0x169   : > { %v799_v58 = vsel %vm3000_vm5, 0.0, %v791_v20  ;;  %v909_v15 = vadd.f32 %v901_v19, %v875_v50  ;;  %v811_v5 = vmul.f32 %v2669_v36, %v798_v47 }
 0x16a   : > { %v910_v18 = vadd.f32 %v902_v44, %v876_v37  ;;  %v812_v33 = vmul.f32 %v2669_v36, %v799_v58  ;;  %v825_v26 = vpop.permute.xlu0 %824 }
 0x16b   : > { %v827_v29 = vpop.permute.xlu1 %826  ;;  %v921_v63 = vadd.f32 %v2745_v13, %v909_v15  ;;  %v819_v6 = vadd.f32 %v811_v5, %v750_v43 }
 0x16c   : > { %v922_v31 = vadd.f32 %v2745_v13, %v910_v18  ;;  %v828_v7 = vsel %vm413_vm0, %v825_v26, %v827_v29  ;;  %v820_v9 = vadd.f32 %v812_v33, %v751_v54  ;;  %v1846_v54 = vld [vmem:[%s3263_s4 + $0x10] sm:$0xff]   ;;  %vm2065_vm0 = vmmov 0  }
 0x16d   : > { %v856_v36 = vadd.f32 %v848_v35, %v819_v6  ;;  %v836_v55 = vsel %vm2945_vm1, 0.0, %v828_v7  ;;  %v937_v24 = vmul.f32 0.044715, %v921_v63  ;;  %v929_v20 = vmul.f32 0.5, %v921_v63  ;;  %v1847_v7 = vld [vmem:[%s3263_s4 + $0x18] sm:$0xff]  }
 0x16e   : > { %v849_v23 = vmul.f32 %v2671_v53, %v836_v55  ;;  %v880_v34 = vpop.permute.xlu0 %879  ;;  %v938_v30 = vmul.f32 0.044715, %v922_v31  ;;  %v1850_v55 = vld [vmem:[%s3263_s4 + $0x30] sm:$0xff]  }
 0x16f   : > { %v882_v14 = vpop.permute.xlu1 %881  ;;  %v877_v46 = vadd.f32 %v869_v0, %v856_v36  ;;  %v945_v59 = vmul.f32 %v937_v24, %v921_v63  ;;  %v1849_v36 = vld [vmem:[%s3263_s4 + $0x28] sm:$0xff]  }
 0x170   : > { %v883_v21 = vsel %vm414_vm3, %v880_v34, %v882_v14  ;;  %v857_v32 = vadd.f32 %v849_v23, %v820_v9  ;;  %v946_v17 = vmul.f32 %v938_v30, %v922_v31  ;;  %v1851_v9 = vld [vmem:[%s3263_s4 + $0x38] sm:$0xff]   ;;  %v1615_v30 = vld [vmem:[%s3260_s1 + $0x3] ss:$0 sm:$0xff]  ;;  %vm1269_vm3 = vcmask 1043456  }
 0x171   : > { %v891_v22 = vsel %vm3000_vm5, 0.0, %v883_v21  ;;  %v911_v42 = vadd.f32 %v903_v12, %v877_v46  ;;  %v953_v4 = vmul.f32 %v945_v59, %v921_v63  ;;  %v1883_v21 = vld [vmem:[#allocation2 + $0x10] sm:$0xff]  ;;  %v1884_v59 = vld [vmem:[#allocation2 + $0x8] sm:$0xff] }
 0x172   : > { %v904_v51 = vmul.f32 %v2723_v48, %v891_v22  ;;  %v878_v53 = vadd.f32 %v870_v52, %v857_v32  ;;  %v954_v45 = vmul.f32 %v946_v17, %v922_v31  ;;  %v1848_v52 = vld [vmem:[%s3263_s4 + $0x20] sm:$0xff]  }
 0x173   : > { %v923_v25 = vadd.f32 %v2745_v13, %v911_v42  ;;  %v961_v56 = vadd.f32 %v953_v4, %v921_v63  ;;  %v1844_v63 = vld [vmem:[%s3263_s4] sm:$0xff]  }
 0x174   : > { %v912_v27 = vadd.f32 %v904_v51, %v878_v53  ;;  %v962_v8 = vadd.f32 %v954_v45, %v922_v31  ;;  %1710 = vmatpush3.bf16.msra.mxu1 %v1844_v63  ;;  %v1885_v51 = vld [vmem:[#allocation2 + $0x18] sm:$0xff] }
 0x175   : > { %v939_v16 = vmul.f32 0.044715, %v923_v25  ;;  %v969_v62 = vmul.f32 0.7978846, %v961_v56  ;;  %v931_v0 = vmul.f32 0.5, %v923_v25  ;;  %v1886_v56 = vld [vmem:[#allocation2 + $0x20] sm:$0xff] }
 0x176   : > { %v924_v49 = vadd.f32 %v2745_v13, %v912_v27  ;;  %v970_v57 = vmul.f32 0.7978846, %v962_v8  ;;  %v930_v13 = vmul.f32 0.5, %v922_v31  ;;  %v3103_v31 = vld [vmem:[#allocation2] sm:$0xff] }
 0x177   : > { %v947_v3 = vmul.f32 %v939_v16, %v923_v25  ;;  %1868 = vtanh.f32 %v969_v62  ;;  %1711 = vmatprep.subr.bf16.mxu1 %v3103_v31  ;;  %1725 = vmatprep.mubr.msk.bf16.mxu1 %vm2065_vm0, %v3103_v31 }
 0x178   : > { %v940_v1 = vmul.f32 0.044715, %v924_v49  ;;  %1870 = vtanh.f32 %v970_v57  ;;  %v932_v33 = vmul.f32 0.5, %v924_v49  ;;  %1712 = vmatpush3.bf16.msra.mxu1 %v1845_v39 }
 0x179   : > { %v955_v19 = vmul.f32 %v947_v3, %v923_v25  ;;  %1713 = vmatprep.subr.bf16.mxu1 %v3103_v31  ;;  %v1887_v3 = vld [vmem:[#allocation2 + $0x28] sm:$0xff] }
 0x17a   : > { %v948_v44 = vmul.f32 %v940_v1, %v924_v49 }
 0x17b   : > { %v963_v48 = vadd.f32 %v955_v19, %v923_v25 }
 0x17c   : > { %v956_v61 = vmul.f32 %v948_v44, %v924_v49  ;;  %1714 = vmatpush3.bf16.msra.mxu1 %v1846_v54  ;;  %v1852_v54 = vld [vmem:[#allocation8] sm:$0xff]  }
 0x17d   : > { %v971_v38 = vmul.f32 0.7978846, %v963_v48  ;;  %1715 = vmatprep.subr.bf16.mxu1 %v3103_v31  ;;  %1735 = vmatprep.subr.bf16.mxu0 %v1852_v54 }
 0x17e   : > { %v964_v2 = vadd.f32 %v956_v61, %v924_v49  ;;  %1736 = vmatpush3.bf16.msra.mxu0 %v1852_v54 }
 0x17f   : > { %1872 = vtanh.f32 %v971_v38  ;;  %v1888_v38 = vld [vmem:[#allocation2 + $0x30] sm:$0xff] }
 0x180   : > { %v972_v50 = vmul.f32 0.7978846, %v964_v2  ;;  %1716 = vmatpush3.bf16.msra.mxu1 %v1847_v7  ;;  %v1853_v7 = vld [vmem:[#allocation8 + $0x8] sm:$0xff]  }
 0x181   : > { %v1869_v37 = vpop.eup %1868  ;;  %1717 = vmatprep.subr.bf16.mxu1 %v3103_v31  ;;  %1737 = vmatprep.subr.bf16.mxu0 %v1853_v7 }
 0x182   : > { %1874 = vtanh.f32 %v972_v50  ;;  %v1871_v60 = vpop.eup %1870  ;;  %v985_v28 = vadd.f32 1.0, %v1869_v37  ;;  %1738 = vmatpush3.bf16.msra.mxu0 %v1853_v7 }
 0x183   : > { %v986_v10 = vadd.f32 1.0, %v1871_v60 }
 0x184   : > { %v993_v47 = vmul.f32 %v985_v28, %v929_v20  ;;  %1718 = vmatpush3.bf16.msra.mxu1 %v1848_v52  ;;  %v1855_v52 = vld [vmem:[#allocation8 + $0x18] sm:$0xff]  }
 0x185   : > { %v994_v58 = vmul.f32 %v986_v10, %v930_v13  ;;  %1719 = vmatprep.subr.bf16.mxu1 %v3103_v31 }
 0x187   : > { %v999_v15 = vpack.c.bf16 %v994_v58, %v993_v47 }
 0x188   : > { %1720 = vmatpush3.bf16.msra.mxu1 %v1849_v36  ;;  %v1856_v36 = vld [vmem:[#allocation8 + $0x20] sm:$0xff]  }
 0x189   : > { %v1873_v18 = vpop.eup %1872  ;;  %1705 = vmatprep.mubr.bf16.mxu0 %v999_v15  ;;  %1721 = vmatprep.subr.bf16.mxu1 %v3103_v31 }
 0x18a   : > { %v987_v43 = vadd.f32 1.0, %v1873_v18 }
 0x18c   : > { %v1875_v5 = vpop.eup %1874  ;;  %v995_v29 = vmul.f32 %v987_v43, %v931_v0  ;;  %1722 = vmatpush3.bf16.msra.mxu1 %v1850_v55  ;;  %v1857_v55 = vld [vmem:[#allocation8 + $0x28] sm:$0xff]  }
 0x18d   : > { %v988_v26 = vadd.f32 1.0, %v1875_v5  ;;  %1723 = vmatprep.subr.bf16.mxu1 %v3103_v31 }
 0x18f   : > { %v996_v35 = vmul.f32 %v988_v26, %v932_v33 }
 0x190   : > { %1724 = vmatpush3.bf16.msra.mxu1 %v1851_v9  ;;  %v1858_v9 = vld [vmem:[#allocation8 + $0x30] sm:$0xff]  }
 0x191   : > { %v1000_v6 = vpack.c.bf16 %v996_v35, %v995_v29  ;;  %1729 = vmatprep.subr.bf16.mxu1 %v3103_v31 }
 0x193   : > { %1706 = vmatmul.mubr.bf16.gmra.mrb[4].mxu0 %v1000_v6 }
 0x235   : > { %v1703_v23 = vpop.f32.mrb[0].mxu0 }
 0x236   : > { %v1103_v34 = vpop.f32.mrb[1].mxu0  ;;  %v1112_v22 = vadd.f32 %v1703_v23, %v1615_v30  ;;  %v1859_v23 = vld [vmem:[#allocation8 + $0x38] sm:$0xff]  }
 0x237   : > { %v1704_v14 = vpop.f32.mrb[2].mxu0  ;;  %v1104_v46 = vadd.f32 %v1615_v30, %v1103_v34  ;;  %v366_v34 = vld [vmem:[%s3260_s1 + $0x4] sm:$0x1] }
 0x238   : > { %v1106_v24 = vpop.f32.mrb[3].mxu0  ;;  %v3145_v53 = vadd.f32 %v1885_v51, %v1112_v22  ;;  %v1115_v4 = vadd.f32 %v1704_v14, %v1615_v30 }
 0x239   : > { %v1107_v12 = vadd.f32 %v1615_v30, %v1106_v24  ;;  %v3141_v17 = vadd.f32 %v1884_v59, %v1104_v46 }
 0x23a   : > { %v3148_v8 = vadd.f32 %v1886_v56, %v1115_v4 }
 0x23b   : > { %v3139_v32 = vadd.f32 %v1883_v21, %v1107_v12 }
 0x23d   : > { %v1142_v42 = vadd.f32 %v3139_v32, %v3141_v17 }
 0x23f   : > { %v1143_v45 = vadd.f32 %v1142_v42, %v3145_v53  ;;  %v1321_v42 = vsub.s32 0, %v2506_v41 }
 0x241   : > { %v1144_v19 = vadd.f32 %v1143_v45, %v3148_v8 }
 0x266   : > { %v1707_v25 = vpop.f32.mrb[4].mxu0 }
 0x267   : > { %v1119_v27 = vpop.f32.mrb[5].mxu0  ;;  %v1128_v57 = vadd.f32 %v1707_v25, %v1615_v30 }
 0x268   : > { %v1120_v16 = vadd.f32 %v1615_v30, %v1119_v27  ;;  %v1708_v49 = vpop.f32.mrb[6].mxu0 }
 0x269   : > { %v1122_v62 = vpop.f32.mrb[7].mxu0  ;;  %v1131_v61 = vadd.f32 %v1708_v49, %v1615_v30  ;;  %v3157_v50 = vadd.f32 %v3052_v40, %v1128_v57  ;;  %v1264_v40 = vld [vmem:[%s3265_s6] sm:$0xf] }
 0x26a   : > { %v3150_v1 = vadd.f32 %v1887_v3, %v1120_v16  ;;  %v1123_v44 = vadd.f32 %v1615_v30, %v1122_v62  ;;  %v1271_v0 = vsel %vm1269_vm3, %v1264_v40, 0 }
 0x26b   : > { %v3161_v60 = vadd.f32 %v3056_v11, %v1131_v61  ;;  %v1173_v11 = vld [vmem:[%s3264_s5] sm:$0x1] }
 0x26c   : > { %v1145_v48 = vadd.f32 %v1144_v19, %v3150_v1  ;;  %v3154_v2 = vadd.f32 %v1888_v38, %v1123_v44  ;;  %v1889_v61 = vld [vmem:[%s2298_s24 + $0x10] sm:$0xff] }
 0x26e   : > { %v1146_v37 = vadd.f32 %v1145_v48, %v3154_v2 }
 0x270   : > { %v1147_v20 = vadd.f32 %v1146_v37, %v3157_v50  ;;  %v1890_v37 = vld [vmem:[%s2298_s24] sm:$0xff] }
 0x272   : > { %v1148_v28 = vadd.f32 %v1147_v20, %v3161_v60 }
 0x274   : > { %v1149_v13 = vrot.slane %v1148_v28, 4 }
 0x276   : > { %v1150_v10 = vadd.f32 %v1149_v13, %v1148_v28  ;;  %v1891_v28 = vld [vmem:[%s2298_s24 + $0x18] sm:$0xff] }
 0x278   : > { %v1151_v47 = vrot.slane %v1150_v10, 2 }
 0x27a   : > { %v1152_v58 = vadd.f32 %v1151_v47, %v1150_v10  ;;  %v1892_v10 = vld [vmem:[%s2298_s24 + $0x8] sm:$0xff] }
 0x27c   : > { %v1153_v15 = vrot.slane %v1152_v58, 1 }
 0x27e   : > { %v1154_v18 = vadd.f32 %v1153_v15, %v1152_v58 }
 0x280   : > { %v1155_v43 = vmul.f32 0.00390625, %v1154_v18 }
 0x282   : > { %v1156_v5 = vpack.c.bf16 %v1155_v43, %v1155_v43 }
 0x284   : > { %1726 = vmatmul.mubr.bf16.vlgmr.msra.gmra.mrb[0].mxu1 %v1156_v5  ;;  %v1893_v5 = vld [vmem:[%s2298_s24 + $0x30] sm:$0xff] }
 0x285   : > { %1730 = vmatpush3.bf16.msra.mxu1 %v1271_v0  ;;  %1731 = vmatprep.mubr.msk.bf16.mxu1 %vm2065_vm0, %v3103_v31  ;;  %v1854_v31 = vld [vmem:[#allocation8 + $0x10] sm:$0xff]  }
 0x286   : > { %1739 = vmatprep.subr.bf16.mxu0 %v1854_v31 }
 0x287   : > { %1740 = vmatpush3.bf16.msra.mxu0 %v1854_v31 }
 0x288   : > { %1741 = vmatprep.subr.bf16.mxu0 %v1855_v52 }
 0x28b   : > { %1742 = vmatpush3.bf16.msra.mxu0 %v1855_v52 }
 0x28c   : > { %1743 = vmatprep.subr.bf16.mxu0 %v1856_v36 }
 0x28f   : > { %1744 = vmatpush3.bf16.msra.mxu0 %v1856_v36 }
 0x290   : > { %1745 = vmatprep.subr.bf16.mxu0 %v1857_v55 }
 0x293   : > { %1746 = vmatpush3.bf16.msra.mxu0 %v1857_v55 }
 0x294   : > { %1747 = vmatprep.subr.bf16.mxu0 %v1858_v9 }
 0x297   : > { %1748 = vmatpush3.bf16.msra.mxu0 %v1858_v9 }
 0x298   : > { %1749 = vmatprep.subr.bf16.mxu0 %v1859_v23 }
 0x29b   : > { %1750 = vmatpush3.bf16.msra.mxu0 %v1859_v23 }
 0x357   : > { %v1256_v33 = vpop.f32.mrb[0].mxu1 }
 0x358   : > { %v1257_v26 = vadd.f32 %v1256_v33, %v1173_v11  ;;  %v1727_v29 = vpop.f32.mrb[1].mxu1 }
 0x359   : > { %v1259_v35 = vpop.f32.mrb[2].mxu1 }
 0x35a   : > { %v1262_v6 = vmax.f32 %v1257_v26, 0.0  ;;  %v1728_v63 = vpop.f32.mrb[3].mxu1  ;;  %v1894_v26 = vld [vmem:[%s2298_s24 + $0x20] sm:$0xff] }
 0x35c   : > { %v1263_v39 = vpack.c.bf16 %v1262_v6, %v1262_v6  ;;  %v1895_v6 = vld [vmem:[%s2298_s24 + $0x38] sm:$0xff] }
 0x35e   : > { %1732 = vmatmul.mubr.msk.bf16.vlgmr.msra.gmra.mrb[4].mxu1 %vm1265_vm6, %v1263_v39  ;;  %v1896_v39 = vld [vmem:[%s2298_s24 + $0x28] sm:$0xff] }
 0x431   : > { %v1307_v14 = vpop.f32.mrb[4].mxu1 }
 0x432   : > { %v1308_v24 = vadd.f32 %v1307_v14, %v366_v34  ;;  %v1733_v30 = vpop.f32.mrb[5].mxu1 }
 0x433   : > { %v1310_v12 = vpop.f32.mrb[6].mxu1 }
 0x434   : > { %v1633_v46 = vmul.f32 -1.442695, %v1308_v24  ;;  %v1734_v21 = vpop.f32.mrb[7].mxu1 }
 0x436   : > { %1876 = vpow2.f32 %v1633_v46 }
 0x440   : > { %v1877_v22 = vpop.eup %1876 }
 0x441   : > { %v1316_v59 = vadd.f32 1.0, %v1877_v22 }
 0x443   : > { %1878 = vrcp.f32 %v1316_v59 }
 0x44d   : > { %v1879_v51 = vpop.eup %1878 }
 0x44e   : > { %v1322_v4 = vrot.slane %v1879_v51, %v1321_v42 }
 0x450   : > { %v1323_v45 = vmul.f32 %v1322_v4, %v3141_v17  ;;  %v1324_v25 = vmul.f32 %v1322_v4, %v3139_v32  ;;  %v1325_v27 = vmul.f32 %v1322_v4, %v3145_v53  ;;  %v1326_v56 = vmul.f32 %v1322_v4, %v3148_v8  ;;  %v1634_v53 = vld [vmem:[%s3260_s1 + $0x5] ss:$0 sm:$0xff] }
 0x451   : > { %v1327_v16 = vmul.f32 %v1322_v4, %v3150_v1  ;;  %v1328_v49 = vmul.f32 %v1322_v4, %v3154_v2  ;;  %v1329_v41 = vmul.f32 %v1322_v4, %v3157_v50  ;;  %v1330_v32 = vmul.f32 %v1322_v4, %v3161_v60 }
 0x452   : > { %v1331_v62 = vpack.c.bf16 %v1324_v25, %v1323_v45  ;;  %v1332_v57 = vpack.c.bf16 %v1326_v56, %v1325_v27 }
 0x453   : > { %v1333_v3 = vpack.c.bf16 %v1328_v49, %v1327_v16  ;;  %v1334_v17 = vpack.c.bf16 %v1330_v32, %v1329_v41 }
 0x454   : > { %1751 = vmatprep.mubr.bf16.mxu0 %v1331_v62 }
 0x455   : > { %1752 = vmatmul.mubr.bf16.vlgmr.msra.gmra.mrb[8].mxu0 %v1332_v57 }
 0x456   : > { %1755 = vmatprep.mubr.bf16.mxu0 %v1333_v3 }
 0x45d   : > { %1756 = vmatmul.mubr.bf16.gmra.mrb[12].mxu0 %v1334_v17 }
 0x528   : > { %v1753_v8 = vpop.f32.mrb[8].mxu0 }
 0x529   : > { %v1446_v1 = vadd.f32 %v1753_v8, %v1634_v53  ;;  %v1437_v19 = vpop.f32.mrb[9].mxu0 }
 0x52a   : > { %v1438_v44 = vadd.f32 %v1634_v53, %v1437_v19  ;;  %v1754_v48 = vpop.f32.mrb[10].mxu0 }
 0x52b   : > { %v1470_v38 = vadd.f32 %v1889_v61, %v1446_v1  ;;  %v1449_v2 = vadd.f32 %v1754_v48, %v1634_v53  ;;  %v1440_v50 = vpop.f32.mrb[11].mxu0 }
 0x52c   : > { %v1468_v60 = vadd.f32 %v1890_v37, %v1438_v44  ;;  %v1441_v20 = vadd.f32 %v1634_v53, %v1440_v50 }
 0x52d   : > { %1478 = vst [vmem:[%s3192_s10 + $0x10] sm:$0xff] %v1470_v38  ;;  %v1471_v13 = vadd.f32 %v1891_v28, %v1449_v2 }
 0x52e   : > { %1476 = vst [vmem:[%s3192_s10] sm:$0xff] %v1468_v60  ;;  %v1469_v47 = vadd.f32 %v1892_v10, %v1441_v20 }
 0x52f   : > { %1479 = vst [vmem:[%s3192_s10 + $0x18] sm:$0xff] %v1471_v13 }
 0x530   : > { %1477 = vst [vmem:[%s3192_s10 + $0x8] sm:$0xff] %v1469_v47  ;;  %v1757_v58 = vpop.f32.mrb[12].mxu0 }
 0x531   : > { %v1462_v15 = vadd.f32 %v1757_v58, %v1634_v53  ;;  %v1453_v18 = vpop.f32.mrb[13].mxu0 }
 0x532   : > { %v1454_v40 = vadd.f32 %v1634_v53, %v1453_v18  ;;  %v1758_v43 = vpop.f32.mrb[14].mxu0 }
 0x533   : > { %v1474_v0 = vadd.f32 %v1893_v5, %v1462_v15  ;;  %v1465_v11 = vadd.f32 %v1758_v43, %v1634_v53  ;;  %v1456_v33 = vpop.f32.mrb[15].mxu0 }
 0x534   : > { %v1472_v29 = vadd.f32 %v1894_v26, %v1454_v40  ;;  %v1457_v35 = vadd.f32 %v1634_v53, %v1456_v33 }
 0x535   : > { %1482 = vst [vmem:[%s3192_s10 + $0x30] sm:$0xff] %v1474_v0  ;;  %v1475_v63 = vadd.f32 %v1895_v6, %v1465_v11 }
 0x536   : > { %1480 = vst [vmem:[%s3192_s10 + $0x20] sm:$0xff] %v1472_v29  ;;  %v1473_v54 = vadd.f32 %v1896_v39, %v1457_v35 }
 0x537   : > { %1483 = vst [vmem:[%s3192_s10 + $0x38] sm:$0xff] %v1475_v63 }
 0x538   : > { %1481 = vst [vmem:[%s3192_s10 + $0x28] sm:$0xff] %v1473_v54 }
 0x539   : > { %1996 = shalt.err (!%p1993_p1)
}
 0x53a   : > { %s1997_s24 = scalar_lea.hbm %s3211_s18, 1024  ;;  %s2001_s20 = scalar_lea.hbm %s3267_s8, 2048 }
 0x53b   : > { %p1998_p13 = scmp.ne.s32.totalorder %s3211_s18, %s1997_s24  ;;  %p2002_p4 = scmp.lt.u32.totalorder %s3211_s18, %s3267_s8 }
 0x53c   : > { %p2003_p7 = scmp.lt.u32.totalorder %s2001_s20, %s1997_s24  ;;  %p2005_p11 = scmp.lt.u32.totalorder %s1997_s24, %s3211_s18 }
 0x53d   : > { %p1999_p6 = pnand %p1998_p13, %p3333_p0 }
 0x53e   : > { %p2004_p8 = por %p2003_p7, %p2002_p4 }
 0x53f   : > { %p2000_p10 = pneg %p1999_p6 }
 0x540   : > { %p2006_p2 = por %p2005_p11, %p2004_p8 }
 0x542   : > { %p2007_p3 = pnand %p2006_p2, %p2000_p10 }
 0x544   : > { %2010 = shalt.err (!%p2007_p3)
}
 0x545   : > { %s2067_s14 = smov 128   ;;  %s2068_s17 = smov 8  }
 0x546   : > { %1769 = dma.vmem_to_hbm [thread:$0]  (%p3333_p0), %s3203_s16, 1024, %s3211_s18, %s1485_s19, %s2067_s14, %s2067_s14, %s2068_s17  }
 0x547 PF: > { %s1513_s15 = sand.u32 1, %s2041_s27   ;;  %p3334_p5 = scmp.ne.s32.totalorder %s3274_s12, 0 }
 0x548   : > { %p3335_p9 = scmp.ge.s32.totalorder %s2053_s30, 2  ;;  %s1514_s11 = scalar_lea.sflag [#allocation5], %s1513_s15 }
 0x54a   : > { %p1783_p12 = pnand %p3335_p9, %p3334_p5 }
 0x54c   : > { %2036 = dma.done.wait (!%p1783_p12), %s1514_s11, 1024  }
 0x54d   : > { %2038 = vsyncadd (!%p1783_p12), %s1514_s11, 4294966272  ;;  %p22_p1 = scmp.ge.s32.totalorder %s2227_s22, 4   ;;  %s3336_s27 = smov %s2045_s28 }
 0x54e   : > { %s3337_s28 = smov %s2049_s29  ;;  %s3338_s29 = smov %s2236_s25 }
 0x54f   : > { %s3339_s30 = smov %s2227_s22  ;;  %24 = sbr.rel (!%p22_p1) target bundleno = 6 (0x6), region = 105 }
 0x556   :  { %1519 = vsyncpa [#allocation4], 1 }
 0x557   :  { %1521 = vsyncpa [#allocation4 + $0x1], 1 }
 0x558   :  { %1522 = vsyncpa [#allocation7], 1 }
 0x559   :  { %1523 = vsyncpa [#allocation5], 1 }
 0x55a   :  { %1525 = vsyncpa [#allocation5 + $0x1], 1 }

</bundles_post_ra>
